<compile_context>
chip_gen: v7x
topology: tpu7x:2x2x1
jax: 0.10.0
libtpu: 0.0.40
codegen_flags: <defaults>
</compile_context>

<pallas_src>
import math

import jax
import jax.numpy as jnp
from jax import lax
from jax.experimental import pallas as pl
from jax.experimental.pallas import tpu as pltpu


def _round_up(x, m):
    return (x + m - 1) // m * m


_INV_SQRT2 = 0.7071067811865476


def _gelu_exact(x):
    # nn.GELU() default (approximate='none'): 0.5 * x * (1 + erf(x / sqrt(2))).
    # NOTE: a tanh-approximate GELU would move the transcendental onto the EUP
    # slot (cheaper on v6e/v7x) but changes module semantics -> keep exact erf.
    return 0.5 * x * (1.0 + lax.erf(x * _INV_SQRT2))


# ---------------------------------------------------------------------------
# Stage 1: mean over cells + 3-layer MLP + L2 normalize  ->  z (bf16)
# ---------------------------------------------------------------------------
def _mlp_norm_kernel(x_ref, w1_ref, b1_ref, w2_ref, b2_ref, w3_ref, b3_ref,
                     z_ref):
    # TODO(synk): the use_bn=True branch (BatchNorm1d between Linear and GELU)
    # is not implemented; the module's default config (use_bn=False) is used.
    n_cells = x_ref.shape[0]
    # Mean over cells as a short unrolled loop of dense (tm, in_dim) adds.
    acc = x_ref[0].astype(jnp.float32)
    for c in range(1, n_cells):
        acc = acc + x_ref[c].astype(jnp.float32)
    x = acc * (1.0 / n_cells)                                      # (TM, in_dim)

    h = jnp.dot(x.astype(jnp.bfloat16), w1_ref[...],
                preferred_element_type=jnp.float32) + b1_ref[...]
    h = _gelu_exact(h)
    h = jnp.dot(h.astype(jnp.bfloat16), w2_ref[...],
                preferred_element_type=jnp.float32) + b2_ref[...]
    h = _gelu_exact(h)
    z = jnp.dot(h.astype(jnp.bfloat16), w3_ref[...],
                preferred_element_type=jnp.float32) + b3_ref[...]
    # F.normalize(z, dim=-1, p=2, eps=1e-12) == z * rsqrt(max(||z||^2, 1e-24))
    ss = jnp.sum(z * z, axis=-1, keepdims=True)
    z = z * lax.rsqrt(jnp.maximum(ss, 1e-24))                      # EUP rsqrt
    z_ref[...] = z.astype(z_ref.dtype)


# ---------------------------------------------------------------------------
# Stage 2: weight-normalized last layer, y = (z @ v) * scale
#          (scale = g / ||v_col|| is precomputed in XLA and streamed in)
# ---------------------------------------------------------------------------
def _last_layer_kernel(z_ref, v_ref, s_ref, o_ref):
    acc = jnp.dot(z_ref[...], v_ref[...], preferred_element_type=jnp.float32)
    o_ref[...] = (acc * s_ref[...]).astype(o_ref.dtype)


def _pick_tiles(B, mlp_batch_tile, batch_tile):
    """Stage-1 tile tm1 and stage-2 tile tm2 (a multiple of tm1).

    Prefer a stage-2 tile that divides B exactly so the final [:B] slice of the
    huge (B, out_dim) output is a no-op instead of a full extra HBM copy.
    """
    b16 = _round_up(B, 16)
    tm1 = _round_up(min(mlp_batch_tile, b16), 16)
    cap = min(batch_tile, b16)
    n = max(cap // tm1, 1)
    tm2 = tm1 * n
    for k in range(n, 0, -1):
        if B % (tm1 * k) == 0:
            tm2 = tm1 * k
            break
    return tm1, tm2


def dino_head_cells_forward(x, params, n_cells, *, batch_tile=512,
                            out_tile=4096, mlp_batch_tile=256,
                            out_dtype=jnp.float32):
    """x: (B*n_cells, in_dim) float32. Returns (B, out_dim) `out_dtype`.

    out_tile=4096 keeps the stage-2 footprint ~20 MiB (safe on v7x's 64 MiB
    VMEM); on v5e/v6e it can be swept up to 8192.  Passing out_dtype=bf16
    halves the dominant HBM traffic (the output write) if the consumer allows.
    """
    (w1, b1, w2, b2, w3, b3, v, g) = params
    in_dim = x.shape[-1]
    assert x.shape[0] % n_cells == 0
    B = x.shape[0] // n_cells
    bottleneck = w3.shape[1]
    out_dim = v.shape[1]

    # --- batch tiling (multiples of 16 so bf16 z tiles are sublane aligned) --
    tm1, tm2 = _pick_tiles(B, mlp_batch_tile, batch_tile)
    B_pad = _round_up(B, tm2)          # multiple of both tm1 and tm2

    # Cells-leading layout: block (n_cells, tm1, in_dim) has dense trailing
    # dims -> no sublane padding of the largest stage-1 input when n_cells < 8.
    x_t = x.reshape(B, n_cells, in_dim).transpose(1, 0, 2)
    if B_pad != B:
        x_t = jnp.pad(x_t, ((0, 0), (0, B_pad - B), (0, 0)))
    nbm1 = B_pad // tm1
    nbm2 = B_pad // tm2

    # --- out_dim tiling (lane-dense output: multiples of 128) ---------------
    tn = min(out_tile, _round_up(out_dim, 128))
    out_pad = _round_up(out_dim, tn)

    # Weight-norm column scale g / ||v_col|| precomputed ONCE in XLA (hoisted
    # out of the stage-2 kernel per review).  Padded columns get scale=0.
    vf = v.astype(jnp.float32)
    scale = g * lax.rsqrt(
        jnp.maximum(jnp.sum(vf * vf, axis=0, keepdims=True), 1e-30))
    if out_pad != out_dim:
        v = jnp.pad(v, ((0, 0), (0, out_pad - out_dim)))
        scale = jnp.pad(scale, ((0, 0), (0, out_pad - out_dim)))
    nnt = out_pad // tn

    def _full(a):
        nd = a.ndim
        return pl.BlockSpec(a.shape, lambda i, _nd=nd: (0,) * _nd)

    # ------------- stage 1: z = normalize(MLP(mean_cells(x))) ---------------
    # TODO(synk): the grid-invariant weight specs are still double-buffered by
    # the default pipeliner; single-buffering them (pl.Buffered(1) / scratch
    # preload) would halve the weight VMEM footprint for v7x headroom.
    z = pl.pallas_call(
        _mlp_norm_kernel,
        out_shape=jax.ShapeDtypeStruct((B_pad, bottleneck), jnp.bfloat16),
        grid=(nbm1,),
        in_specs=[
            pl.BlockSpec((n_cells, tm1, in_dim), lambda i: (0, i, 0)),
            _full(w1), _full(b1), _full(w2), _full(b2), _full(w3), _full(b3),
        ],
        out_specs=pl.BlockSpec((tm1, bottleneck), lambda i: (i, 0)),
        compiler_params=pltpu.CompilerParams(
            dimension_semantics=("parallel",),
            vmem_limit_bytes=48 * 1024 * 1024),
    )(x_t, w1, b1, w2, b2, w3, b3)

    # ------------- stage 2: y = (z @ v) * scale ------------------------------
    # Grid order (out tiles, batch tiles): batch is the fastest axis, so each
    # (bottleneck, TN) v tile is DMA'd from HBM exactly once while the tiny z
    # tile re-streams cheaply.  Both axes independent -> "parallel" (megacore).
    out = pl.pallas_call(
        _last_layer_kernel,
        out_shape=jax.ShapeDtypeStruct((B_pad, out_pad), out_dtype),
        grid=(nnt, nbm2),
        in_specs=[
            pl.BlockSpec((tm2, bottleneck), lambda j, i: (i, 0)),
            pl.BlockSpec((bottleneck, tn), lambda j, i: (0, j)),
            pl.BlockSpec((1, tn), lambda j, i: (0, j)),
        ],
        out_specs=pl.BlockSpec((tm2, tn), lambda j, i: (i, j)),
        compiler_params=pltpu.CompilerParams(
            dimension_semantics=("parallel", "parallel"),
            vmem_limit_bytes=48 * 1024 * 1024),
    )(z, v, scale)

    if B_pad == B and out_pad == out_dim:
        return out
    return out[:B, :out_dim]


def init_params(key, in_dim, hidden_dim, bottleneck_dim, out_dim):
    k1, k2, k3, k4 = jax.random.split(key, 4)

    def trunc(k, shape):
        return (0.02 * jax.random.truncated_normal(
            k, -2.0, 2.0, shape)).astype(jnp.bfloat16)

    # MLP weights stored transposed (in, out) in bf16; biases zero (f32).
    w1 = trunc(k1, (in_dim, hidden_dim))
    b1 = jnp.zeros((1, hidden_dim), jnp.float32)
    w2 = trunc(k2, (hidden_dim, hidden_dim))
    b2 = jnp.zeros((1, hidden_dim), jnp.float32)
    w3 = trunc(k3, (hidden_dim, bottleneck_dim))
    b3 = jnp.zeros((1, bottleneck_dim), jnp.float32)
    # weight_norm direction v (transposed: (bottleneck, out_dim)), g = 1.
    bound = 1.0 / math.sqrt(bottleneck_dim)
    v = jax.random.uniform(
        k4, (bottleneck_dim, out_dim), jnp.float32, -bound, bound
    ).astype(jnp.bfloat16)
    g = jnp.ones((1, out_dim), jnp.float32)
    return (w1, b1, w2, b2, w3, b3, v, g)


def reference_forward(x, params, n_cells):
    """Pure-JAX f32 reference on the same (bf16-stored) parameters."""
    (w1, b1, w2, b2, w3, b3, v, g) = params
    f32 = lambda a: a.astype(jnp.float32)
    B = x.shape[0] // n_cells
    h = jnp.mean(x.reshape(B, n_cells, -1).astype(jnp.float32), axis=1)
    h = jax.nn.gelu(h @ f32(w1) + b1, approximate=False)
    h = jax.nn.gelu(h @ f32(w2) + b2, approximate=False)
    z = h @ f32(w3) + b3
    z = z / jnp.maximum(jnp.linalg.norm(z, axis=-1, keepdims=True), 1e-12)
    w_last = g * f32(v) / jnp.linalg.norm(f32(v), axis=0, keepdims=True)
    return z @ w_last


if __name__ == "__main__":
    # Small shapes consistent with the module (real config would be e.g.
    # hidden=2048, bottleneck=256, out_dim=65536 -- scaled down here).
    in_dim, hidden_dim, bottleneck_dim, out_dim = 256, 512, 256, 500
    n_cells, B = 4, 6

    key = jax.random.PRNGKey(0)
    kx, kp = jax.random.split(key)
    x = jax.random.normal(kx, (B * n_cells, in_dim), jnp.float32)
    params = init_params(kp, in_dim, hidden_dim, bottleneck_dim, out_dim)

    out = dino_head_cells_forward(x, params, n_cells)
    out = jax.block_until_ready(out)

    ref = reference_forward(x, params, n_cells)
    assert out.shape == (B, out_dim)
    max_err = float(jnp.max(jnp.abs(out - ref)))
    assert jnp.allclose(out, ref, atol=1e-2, rtol=1e-2), (
        f"mismatch vs JAX reference (max abs err {max_err})")

    print("KERNEL_OK")
</pallas_src>

<mosaic_0001>
module attributes {stable_mosaic.version = 11 : i64} {
  func.func @_mlp_norm_kernel(%arg0: i32, %arg1: memref<4x16x256xf32, #tpu.memory_space<vmem>>, %arg2: memref<256x512xbf16, #tpu.memory_space<vmem>>, %arg3: memref<1x512xf32, #tpu.memory_space<vmem>>, %arg4: memref<512x512xbf16, #tpu.memory_space<vmem>>, %arg5: memref<1x512xf32, #tpu.memory_space<vmem>>, %arg6: memref<512x256xbf16, #tpu.memory_space<vmem>>, %arg7: memref<1x256xf32, #tpu.memory_space<vmem>>, %arg8: memref<16x256xbf16, #tpu.memory_space<vmem>>) attributes {dimension_semantics = [#tpu.dimension_semantics<parallel>], iteration_bounds = array<i64: 1>, scalar_prefetch = 0 : i64, scratch_operands = 0 : i64, tpu.core_type = #tpu.core_type<tc>, window_params = [{transform_indices = @transform_0, window_bounds = array<i64: 4, 16, 256>}, {pipeline_mode = #tpu.pipeline_mode<synchronous>, transform_indices = @transform_1, window_bounds = array<i64: 256, 512>}, {pipeline_mode = #tpu.pipeline_mode<synchronous>, transform_indices = @transform_2, window_bounds = array<i64: 1, 512>}, {pipeline_mode = #tpu.pipeline_mode<synchronous>, transform_indices = @transform_3, window_bounds = array<i64: 512, 512>}, {pipeline_mode = #tpu.pipeline_mode<synchronous>, transform_indices = @transform_4, window_bounds = array<i64: 1, 512>}, {pipeline_mode = #tpu.pipeline_mode<synchronous>, transform_indices = @transform_5, window_bounds = array<i64: 512, 256>}, {pipeline_mode = #tpu.pipeline_mode<synchronous>, transform_indices = @transform_6, window_bounds = array<i64: 1, 256>}, {transform_indices = @transform_7, window_bounds = array<i64: 16, 256>}]} {
    %c0 = arith.constant 0 : index
    %c0_0 = arith.constant 0 : index
    %c0_1 = arith.constant 0 : index
    %0 = vector.load %arg1[%c0, %c0_0, %c0_1] : memref<4x16x256xf32, #tpu.memory_space<vmem>>, vector<1x16x256xf32>
    %1 = vector.shape_cast %0 : vector<1x16x256xf32> to vector<16x256xf32>
    %c1 = arith.constant 1 : index
    %c0_2 = arith.constant 0 : index
    %c0_3 = arith.constant 0 : index
    %2 = vector.load %arg1[%c1, %c0_2, %c0_3] : memref<4x16x256xf32, #tpu.memory_space<vmem>>, vector<1x16x256xf32>
    %3 = vector.shape_cast %2 : vector<1x16x256xf32> to vector<16x256xf32>
    %4 = arith.addf %1, %3 : vector<16x256xf32>
    %c2 = arith.constant 2 : index
    %c0_4 = arith.constant 0 : index
    %c0_5 = arith.constant 0 : index
    %5 = vector.load %arg1[%c2, %c0_4, %c0_5] : memref<4x16x256xf32, #tpu.memory_space<vmem>>, vector<1x16x256xf32>
    %6 = vector.shape_cast %5 : vector<1x16x256xf32> to vector<16x256xf32>
    %7 = arith.addf %4, %6 : vector<16x256xf32>
    %c3 = arith.constant 3 : index
    %c0_6 = arith.constant 0 : index
    %c0_7 = arith.constant 0 : index
    %8 = vector.load %arg1[%c3, %c0_6, %c0_7] : memref<4x16x256xf32, #tpu.memory_space<vmem>>, vector<1x16x256xf32>
    %9 = vector.shape_cast %8 : vector<1x16x256xf32> to vector<16x256xf32>
    %10 = arith.addf %7, %9 : vector<16x256xf32>
    %cst = arith.constant 2.500000e-01 : f32
    %11 = vector.broadcast %cst : f32 to vector<16x256xf32>
    %12 = arith.mulf %10, %11 : vector<16x256xf32>
    %13 = arith.truncf %12 : vector<16x256xf32> to vector<16x256xbf16>
    %c0_8 = arith.constant 0 : index
    %c0_9 = arith.constant 0 : index
    %14 = vector.load %arg2[%c0_8, %c0_9] : memref<256x512xbf16, #tpu.memory_space<vmem>>, vector<256x512xbf16>
    %cst_10 = arith.constant dense<0.000000e+00> : vector<16x512xf32>
    %15 = tpu.matmul %13, %14, %cst_10 {dimension_numbers = #tpu.dot_dimension_numbers<[1], [0], [0], [1], [0, 0, 1, 1], [], []>} : vector<16x256xbf16>, vector<256x512xbf16>, vector<16x512xf32> -> vector<16x512xf32>
    %c0_11 = arith.constant 0 : index
    %c0_12 = arith.constant 0 : index
    %16 = vector.load %arg3[%c0_11, %c0_12] : memref<1x512xf32, #tpu.memory_space<vmem>>, vector<1x512xf32>
    %17 = vector.broadcast %16 : vector<1x512xf32> to vector<16x512xf32>
    %18 = arith.addf %15, %17 : vector<16x512xf32>
    %cst_13 = arith.constant 5.000000e-01 : f32
    %19 = vector.broadcast %cst_13 : f32 to vector<16x512xf32>
    %20 = arith.mulf %19, %18 : vector<16x512xf32>
    %cst_14 = arith.constant 0.707106769 : f32
    %21 = vector.broadcast %cst_14 : f32 to vector<16x512xf32>
    %22 = arith.mulf %18, %21 : vector<16x512xf32>
    %23 = math.erf %22 : vector<16x512xf32>
    %cst_15 = arith.constant 1.000000e+00 : f32
    %24 = vector.broadcast %cst_15 : f32 to vector<16x512xf32>
    %25 = arith.addf %24, %23 : vector<16x512xf32>
    %26 = arith.mulf %20, %25 : vector<16x512xf32>
    %27 = arith.truncf %26 : vector<16x512xf32> to vector<16x512xbf16>
    %c0_16 = arith.constant 0 : index
    %c0_17 = arith.constant 0 : index
    %28 = vector.load %arg4[%c0_16, %c0_17] : memref<512x512xbf16, #tpu.memory_space<vmem>>, vector<512x512xbf16>
    %cst_18 = arith.constant dense<0.000000e+00> : vector<16x512xf32>
    %29 = tpu.matmul %27, %28, %cst_18 {dimension_numbers = #tpu.dot_dimension_numbers<[1], [0], [0], [1], [0, 0, 1, 1], [], []>} : vector<16x512xbf16>, vector<512x512xbf16>, vector<16x512xf32> -> vector<16x512xf32>
    %c0_19 = arith.constant 0 : index
    %c0_20 = arith.constant 0 : index
    %30 = vector.load %arg5[%c0_19, %c0_20] : memref<1x512xf32, #tpu.memory_space<vmem>>, vector<1x512xf32>
    %31 = vector.broadcast %30 : vector<1x512xf32> to vector<16x512xf32>
    %32 = arith.addf %29, %31 : vector<16x512xf32>
    %cst_21 = arith.constant 5.000000e-01 : f32
    %33 = vector.broadcast %cst_21 : f32 to vector<16x512xf32>
    %34 = arith.mulf %33, %32 : vector<16x512xf32>
    %cst_22 = arith.constant 0.707106769 : f32
    %35 = vector.broadcast %cst_22 : f32 to vector<16x512xf32>
    %36 = arith.mulf %32, %35 : vector<16x512xf32>
    %37 = math.erf %36 : vector<16x512xf32>
    %cst_23 = arith.constant 1.000000e+00 : f32
    %38 = vector.broadcast %cst_23 : f32 to vector<16x512xf32>
    %39 = arith.addf %38, %37 : vector<16x512xf32>
    %40 = arith.mulf %34, %39 : vector<16x512xf32>
    %41 = arith.truncf %40 : vector<16x512xf32> to vector<16x512xbf16>
    %c0_24 = arith.constant 0 : index
    %c0_25 = arith.constant 0 : index
    %42 = vector.load %arg6[%c0_24, %c0_25] : memref<512x256xbf16, #tpu.memory_space<vmem>>, vector<512x256xbf16>
    %cst_26 = arith.constant dense<0.000000e+00> : vector<16x256xf32>
    %43 = tpu.matmul %41, %42, %cst_26 {dimension_numbers = #tpu.dot_dimension_numbers<[1], [0], [0], [1], [0, 0, 1, 1], [], []>} : vector<16x512xbf16>, vector<512x256xbf16>, vector<16x256xf32> -> vector<16x256xf32>
    %c0_27 = arith.constant 0 : index
    %c0_28 = arith.constant 0 : index
    %44 = vector.load %arg7[%c0_27, %c0_28] : memref<1x256xf32, #tpu.memory_space<vmem>>, vector<1x256xf32>
    %45 = vector.broadcast %44 : vector<1x256xf32> to vector<16x256xf32>
    %46 = arith.addf %43, %45 : vector<16x256xf32>
    %47 = arith.mulf %46, %46 : vector<16x256xf32>
    %cst_29 = arith.constant dense<0.000000e+00> : vector<16xf32>
    %48 = vector.multi_reduction <add>, %47, %cst_29 [1] : vector<16x256xf32> to vector<16xf32>
    %49 = vector.shape_cast %48 : vector<16xf32> to vector<16x1xf32>
    %cst_30 = arith.constant 1.000000e-24 : f32
    %50 = vector.broadcast %cst_30 : f32 to vector<16x1xf32>
    %51 = arith.maximumf %49, %50 : vector<16x1xf32>
    %52 = math.rsqrt %51 : vector<16x1xf32>
    %53 = vector.broadcast %52 : vector<16x1xf32> to vector<16x256xf32>
    %54 = arith.mulf %46, %53 : vector<16x256xf32>
    %55 = arith.truncf %54 : vector<16x256xf32> to vector<16x256xbf16>
    %c0_31 = arith.constant 0 : index
    %c0_32 = arith.constant 0 : index
    %56 = vector.load %arg8[%c0_31, %c0_32] : memref<16x256xbf16, #tpu.memory_space<vmem>>, vector<16x256xbf16>
    tpu.vector_store %arg8[%c0_31, %c0_32], %55 {strides = array<i32>} : memref<16x256xbf16, #tpu.memory_space<vmem>>, vector<16x256xbf16>,
    return
  }
  func.func @transform_0(%arg0: i32) -> (i32, i32, i32) {
    %c0_i32 = arith.constant 0 : i32
    %c0_i32_0 = arith.constant 0 : i32
    %c0_i32_1 = arith.constant 0 : i32
    return %c0_i32, %arg0, %c0_i32_0 : i32, i32, i32
  }
  func.func @transform_1(%arg0: i32) -> (i32, i32) {
    %c0_i32 = arith.constant 0 : i32
    %c0_i32_0 = arith.constant 0 : i32
    %c0_i32_1 = arith.constant 0 : i32
    return %c0_i32, %c0_i32_0 : i32, i32
  }
  func.func @transform_2(%arg0: i32) -> (i32, i32) {
    %c0_i32 = arith.constant 0 : i32
    %c0_i32_0 = arith.constant 0 : i32
    %c0_i32_1 = arith.constant 0 : i32
    return %c0_i32, %c0_i32_0 : i32, i32
  }
  func.func @transform_3(%arg0: i32) -> (i32, i32) {
    %c0_i32 = arith.constant 0 : i32
    %c0_i32_0 = arith.constant 0 : i32
    %c0_i32_1 = arith.constant 0 : i32
    return %c0_i32, %c0_i32_0 : i32, i32
  }
  func.func @transform_4(%arg0: i32) -> (i32, i32) {
    %c0_i32 = arith.constant 0 : i32
    %c0_i32_0 = arith.constant 0 : i32
    %c0_i32_1 = arith.constant 0 : i32
    return %c0_i32, %c0_i32_0 : i32, i32
  }
  func.func @transform_5(%arg0: i32) -> (i32, i32) {
    %c0_i32 = arith.constant 0 : i32
    %c0_i32_0 = arith.constant 0 : i32
    %c0_i32_1 = arith.constant 0 : i32
    return %c0_i32, %c0_i32_0 : i32, i32
  }
  func.func @transform_6(%arg0: i32) -> (i32, i32) {
    %c0_i32 = arith.constant 0 : i32
    %c0_i32_0 = arith.constant 0 : i32
    %c0_i32_1 = arith.constant 0 : i32
    return %c0_i32, %c0_i32_0 : i32, i32
  }
  func.func @transform_7(%arg0: i32) -> (i32, i32) {
    %c0_i32 = arith.constant 0 : i32
    %c0_i32_0 = arith.constant 0 : i32
    return %arg0, %c0_i32 : i32, i32
  }
}

</mosaic_0001>

<bundles_post_ra>
// kernel: tpu_custom_call.1
= control target key start
LH: loop header
LB: loop body
LE: loop exit
PB: predicated region body
PF: predicated region fallthrough
CT: control target
= control target key end

     0   :  { %12 = vsyncpa [#allocation3], 0  ;;  %s3219_s0 = inlined_call_operand.hbm [shape: f32[4,16,256], index: 0, kind: input, shape index: {}]   ;;  %s3220_s1 = inlined_call_operand.hbm [shape: bf16[256,512], index: 1, kind: input, shape index: {}]   ;;  %s3221_s2 = inlined_call_operand.vmem [shape: f32[1,512], index: 2, kind: input, shape index: {}]   ;;  %s3222_s3 = inlined_call_operand.hbm [shape: bf16[512,512], index: 3, kind: input, shape index: {}]   ;;  %s3223_s4 = inlined_call_operand.vmem [shape: f32[1,512], index: 4, kind: input, shape index: {}]   ;;  %s3224_s5 = inlined_call_operand.hbm [shape: bf16[512,256], index: 5, kind: input, shape index: {}]   ;;  %s3225_s6 = inlined_call_operand.vmem [shape: f32[1,256], index: 6, kind: input, shape index: {}]   ;;  %s3226_s7 = inlined_call_operand.hbm [shape: bf16[16,256], index: 7, kind: output, shape index: {}]  }
   0x1   :  { %13 = vsyncpa [#allocation6], 0 }
   0x2   :  { %14 = vsyncpa [#allocation9], 0 }
   0x3   :  { %15 = vsyncpa [#allocation4], 0  ;;  %s3025_s24 = smov [#allocation5]   ;;  %s3026_s26 = smov [#allocation2]  }
   0x4   :  { %s33_s25 = sshll.u32 %s3025_s24, 4  ;;  %s21_s27 = sshll.u32 %s3026_s26, 4  ;;  %s34_s25 = int_to_ptr.vmem [resolvable:$true] %s33_s25  ;;  %s3074_s27 = int_to_ptr.vmem [resolvable:$true] %s21_s27 }
   0x5   :  { %s2907_s30 = scalar_lea.hbm %s3220_s1, 8192 }
   0x6   :  { %p2908_p0 = scmp.ne.s32.totalorder %s3220_s1, %s2907_s30  ;;  %p2911_p1 = scmp.lt.u32.totalorder %s2907_s30, %s3220_s1 }
   0x8   :  { %p2913_p2 = pnand %p2911_p1, %p2908_p0 }
   0xa   :  { %2916 = shalt.err (!%p2913_p2)
}
   0xb   :  { %s2917_s12 = scalar_lea.vmem %s34_s25, 8192  ;;  %p2922_p4 = scmp.lt.s32.totalorder %s34_s25, %s34_s25 }
   0xc   :  { %p2918_p3 = scmp.ne.s32.totalorder %s34_s25, %s2917_s12  ;;  %p2923_p5 = scmp.lt.s32.totalorder %s2917_s12, %s2917_s12 }
   0xe   :  { %p2924_p6 = por %p2923_p5, %p2922_p4 }
  0x10   :  { %p2925_p7 = pnand %p2924_p6, %p2918_p3 }
  0x12   :  { %2928 = shalt.err (!%p2925_p7)
}
  0x13   :  { %s3027_s13 = smov 256   ;;  %s3028_s14 = smov 16  }
  0x14   :  { %39 = dma.hbm_to_vmem [thread:$0]  %s3220_s1, 8192, %s34_s25, [#allocation6], %s3027_s13, %s3027_s13, %s3028_s14  }
  0x15   :  { %s2929_s19 = scalar_lea.hbm %s3219_s0, 2048 }
  0x16   :  { %p2930_p8 = scmp.ne.s32.totalorder %s3219_s0, %s2929_s19  ;;  %p2933_p9 = scmp.lt.u32.totalorder %s2929_s19, %s3219_s0 }
  0x18   :  { %p2935_p10 = pnand %p2933_p9, %p2930_p8 }
  0x1a   :  { %2938 = shalt.err (!%p2935_p10)
}
  0x1b   :  { %s2939_s24 = scalar_lea.vmem %s3074_s27, 2048  ;;  %p2944_p12 = scmp.lt.s32.totalorder %s3074_s27, %s3074_s27 }
  0x1c   :  { %p2940_p11 = scmp.ne.s32.totalorder %s3074_s27, %s2939_s24  ;;  %p2945_p13 = scmp.lt.s32.totalorder %s2939_s24, %s2939_s24 }
  0x1e   :  { %p2946_p0 = por %p2945_p13, %p2944_p12 }
  0x20   :  { %p2947_p1 = pnand %p2946_p0, %p2940_p11 }
  0x22   :  { %2950 = shalt.err (!%p2947_p1)
}
  0x23   :  { %27 = dma.hbm_to_vmem [thread:$0]  %s3219_s0, 2048, %s3074_s27, [#allocation3], %s3027_s13, %s3027_s13, %s3028_s14  }
  0x24   :  { %s3029_s26 = smov [#allocation7]   ;;  %s3030_s29 = smov [#allocation8]  }
  0x25   :  { %s47_s28 = sshll.u32 %s3029_s26, 4  ;;  %s61_s30 = sshll.u32 %s3030_s29, 4  ;;  %s48_s28 = int_to_ptr.vmem [resolvable:$true] %s47_s28  ;;  %s3111_s30 = int_to_ptr.vmem [resolvable:$true] %s61_s30 }
  0x26   :  { %s2951_s10 = scalar_lea.hbm %s3222_s3, 16384 }
  0x27   :  { %p2952_p2 = scmp.ne.s32.totalorder %s3222_s3, %s2951_s10  ;;  %p2955_p3 = scmp.lt.u32.totalorder %s2951_s10, %s3222_s3 }
  0x29   :  { %p2957_p4 = pnand %p2955_p3, %p2952_p2 }
  0x2b   :  { %2960 = shalt.err (!%p2957_p4)
}
  0x2c   :  { %s2961_s0 = scalar_lea.vmem %s48_s28, 16384  ;;  %p2966_p6 = scmp.lt.s32.totalorder %s48_s28, %s48_s28 }
  0x2d   :  { %p2962_p5 = scmp.ne.s32.totalorder %s48_s28, %s2961_s0  ;;  %p2967_p7 = scmp.lt.s32.totalorder %s2961_s0, %s2961_s0 }
  0x2f   :  { %p2968_p8 = por %p2967_p7, %p2966_p6 }
  0x31   :  { %p2969_p9 = pnand %p2968_p8, %p2962_p5 }
  0x33   :  { %2972 = shalt.err (!%p2969_p9)
}
  0x34   :  { %53 = dma.hbm_to_vmem [thread:$0]  %s3222_s3, 16384, %s48_s28, [#allocation6], %s3027_s13, %s3027_s13, %s3028_s14  }
  0x35   :  { %s2973_s20 = scalar_lea.hbm %s3224_s5, 8192 }
  0x36   :  { %p2974_p10 = scmp.ne.s32.totalorder %s3224_s5, %s2973_s20  ;;  %p2977_p11 = scmp.lt.u32.totalorder %s2973_s20, %s3224_s5 }
  0x38   :  { %p2979_p12 = pnand %p2977_p11, %p2974_p10 }
  0x3a   :  { %2982 = shalt.err (!%p2979_p12)
}
  0x3b   :  { %s2983_s1 = scalar_lea.vmem %s3111_s30, 8192  ;;  %p2988_p0 = scmp.lt.s32.totalorder %s3111_s30, %s3111_s30 }
  0x3c   :  { %p2984_p13 = scmp.ne.s32.totalorder %s3111_s30, %s2983_s1  ;;  %p2989_p1 = scmp.lt.s32.totalorder %s2983_s1, %s2983_s1 }
  0x3e   :  { %p2990_p2 = por %p2989_p1, %p2988_p0 }
  0x40   :  { %p2991_p3 = pnand %p2990_p2, %p2984_p13 }
  0x42   :  { %2994 = shalt.err (!%p2991_p3)
}
  0x43   :  { %s3031_s3 = smov 128   ;;  %s3032_s13 = smov 8  }
  0x44   :  { %67 = dma.hbm_to_vmem [thread:$0]  %s3224_s5, 8192, %s3111_s30, [#allocation9], %s3031_s3, %s3031_s3, %s3032_s13  }
  0x45   :  { %3017 = dma.done.wait [#allocation3], 2048  }
  0x46   :  { %3018 = vsyncadd [#allocation3], 4294965248 }
  0x47   :  { %3019 = dma.done.wait [#allocation6], 24576  }
  0x48   :  { %3020 = vsyncadd [#allocation6], 4294942720 }
  0x49   :  { %3021 = dma.done.wait [#allocation9], 8192  }
  0x4a   :  { %3022 = vsyncadd [#allocation9], 4294959104  ;;  %v2487_v0 = vld [vmem:[#allocation5 + $0x4] ss:$16 sps:$4 sm:$0xff]   ;;  %v2489_v1 = vld [vmem:[#allocation5] ss:$16 sps:$4 sm:$0xff]  }
  0x4b   :  { %525 = vmatprep.subr.bf16.mxu1 %v2487_v0  ;;  %v2490_v2 = vld [vmem:[#allocation5 + $0x24] ss:$16 sps:$4 sm:$0xff]   ;;  %v2492_v3 = vld [vmem:[#allocation5 + $0x20] ss:$16 sps:$4 sm:$0xff]   ;;  %v83_v13 = vld [vmem:[#allocation2 + $0x8] sm:$0xff] }
  0x4c   :  { %526 = vmatpush1.bf16.msra.mxu1 %v2489_v1  ;;  %v2493_v4 = vld [vmem:[#allocation5 + $0x44] ss:$16 sps:$4 sm:$0xff]   ;;  %v2495_v5 = vld [vmem:[#allocation5 + $0x40] ss:$16 sps:$4 sm:$0xff]   ;;  %v85_v14 = vld [vmem:[#allocation2 + $0x18] sm:$0xff] }
  0x4d   :  { %527 = vmatprep.subr.bf16.mxu1 %v2490_v2  ;;  %v2496_v6 = vld [vmem:[#allocation5 + $0x64] ss:$16 sps:$4 sm:$0xff]   ;;  %v2498_v7 = vld [vmem:[#allocation5 + $0x60] ss:$16 sps:$4 sm:$0xff]   ;;  %v88_v15 = vld [vmem:[#allocation2 + $0x28] sm:$0xff] }
  0x4e   :  { %v2499_v8 = vld [vmem:[#allocation5 + $0x84] ss:$16 sps:$4 sm:$0xff]   ;;  %v2501_v9 = vld [vmem:[#allocation5 + $0x80] ss:$16 sps:$4 sm:$0xff]   ;;  %v90_v16 = vld [vmem:[#allocation2 + $0x38] sm:$0xff]  ;;  %v92_v19 = vadd.f32 %v88_v15, %v83_v13 }
  0x4f   :  { %v2502_v10 = vld [vmem:[#allocation5 + $0xa4] ss:$16 sps:$4 sm:$0xff]   ;;  %v2504_v11 = vld [vmem:[#allocation5 + $0xa0] ss:$16 sps:$4 sm:$0xff]   ;;  %v97_v17 = vld [vmem:[#allocation2 + $0x48] sm:$0xff]  ;;  %v94_v20 = vadd.f32 %v90_v16, %v85_v14 }
  0x50   :  { %528 = vmatpush1.bf16.msra.mxu1 %v2492_v3  ;;  %v2505_v12 = vld [vmem:[#allocation5 + $0xc4] ss:$16 sps:$4 sm:$0xff]   ;;  %v2507_v18 = vld [vmem:[#allocation5 + $0xc0] ss:$16 sps:$4 sm:$0xff]   ;;  %v99_v21 = vld [vmem:[#allocation2 + $0x58] sm:$0xff]  ;;  %v101_v25 = vadd.f32 %v97_v17, %v92_v19 }
  0x51   :  { %529 = vmatprep.subr.bf16.mxu1 %v2493_v4  ;;  %v2508_v22 = vld [vmem:[#allocation5 + $0xe4] ss:$16 sps:$4 sm:$0xff]   ;;  %v106_v23 = vld [vmem:[#allocation2 + $0x68] sm:$0xff]  ;;  %v108_v24 = vld [vmem:[#allocation2 + $0x78] sm:$0xff]  ;;  %v103_v26 = vadd.f32 %v99_v21, %v94_v20 }
  0x52   :  { %v2510_v27 = vld [vmem:[#allocation5 + $0xe0] ss:$16 sps:$4 sm:$0xff]   ;;  %v110_v28 = vadd.f32 %v106_v23, %v101_v25  ;;  %v2511_v30 = vld [vmem:[#allocation5 + $0x104] ss:$16 sps:$4 sm:$0xff]   ;;  %v2540_v13 = vld [vmem:[#allocation5 + $0x2c] ss:$16 sps:$4 sm:$0xff]  }
  0x53   :  { %v112_v29 = vadd.f32 %v108_v24, %v103_v26  ;;  %v2513_v33 = vld [vmem:[#allocation5 + $0x100] ss:$16 sps:$4 sm:$0xff]   ;;  %v2514_v35 = vld [vmem:[#allocation5 + $0x124] ss:$16 sps:$4 sm:$0xff]   ;;  %v2538_v16 = vld [vmem:[#allocation5 + $0x28] ss:$16 sps:$4 sm:$0xff]  }
  0x54   :  { %530 = vmatpush1.bf16.msra.mxu1 %v2495_v5  ;;  %v114_v31 = vmul.f32 0.25, %v110_v28  ;;  %v2516_v36 = vld [vmem:[#allocation5 + $0x120] ss:$16 sps:$4 sm:$0xff]   ;;  %v2517_v37 = vld [vmem:[#allocation5 + $0x144] ss:$16 sps:$4 sm:$0xff]  }
  0x55   :  { %531 = vmatprep.subr.bf16.mxu1 %v2496_v6  ;;  %v116_v32 = vmul.f32 0.25, %v112_v29  ;;  %v2519_v38 = vld [vmem:[#allocation5 + $0x140] ss:$16 sps:$4 sm:$0xff]   ;;  %v2520_v39 = vld [vmem:[#allocation5 + $0x164] ss:$16 sps:$4 sm:$0xff]  }
  0x56   :  { %v2522_v40 = vld [vmem:[#allocation5 + $0x160] ss:$16 sps:$4 sm:$0xff]   ;;  %v2523_v45 = vld [vmem:[#allocation5 + $0x184] ss:$16 sps:$4 sm:$0xff]   ;;  %v2543_v17 = vld [vmem:[#allocation5 + $0x4c] ss:$16 sps:$4 sm:$0xff]  }
  0x57   :  { %v3148_v34 = vpack.c.bf16 %v116_v32, %v114_v31  ;;  %v82_v41 = vld [vmem:[#allocation2] sm:$0xff]  ;;  %v84_v42 = vld [vmem:[#allocation2 + $0x10] sm:$0xff]  ;;  %v2541_v20 = vld [vmem:[#allocation5 + $0x48] ss:$16 sps:$4 sm:$0xff]  }
  0x58   :  { %532 = vmatpush1.bf16.msra.mxu1 %v2498_v7  ;;  %v87_v43 = vld [vmem:[#allocation2 + $0x20] sm:$0xff]  ;;  %v89_v44 = vld [vmem:[#allocation2 + $0x30] sm:$0xff]  ;;  %v2546_v21 = vld [vmem:[#allocation5 + $0x6c] ss:$16 sps:$4 sm:$0xff]  }
  0x59   :  { %533 = vmatprep.subr.bf16.mxu1 %v2499_v8  ;;  %557 = vmatprep.mubr.bf16.mxu1 %v3148_v34  ;;  %v2525_v46 = vld [vmem:[#allocation5 + $0x180] ss:$16 sps:$4 sm:$0xff]   ;;  %v2526_v47 = vld [vmem:[#allocation5 + $0x1a4] ss:$16 sps:$4 sm:$0xff]   ;;  %v91_v48 = vadd.f32 %v87_v43, %v82_v41  ;;  %v93_v49 = vadd.f32 %v89_v44, %v84_v42  ;;  %v2537_v8 = vld [vmem:[#allocation5 + $0xc] ss:$16 sps:$4 sm:$0xff]  }
  0x5a   :  { %v96_v50 = vld [vmem:[#allocation2 + $0x40] sm:$0xff]  ;;  %v98_v51 = vld [vmem:[#allocation2 + $0x50] sm:$0xff]  ;;  %v2544_v24 = vld [vmem:[#allocation5 + $0x68] ss:$16 sps:$4 sm:$0xff]  }
  0x5b   :  { %v2583_v52 = vld [vmem:[#allocation7 + $0x4] ss:$16 sps:$4 sm:$0xff]   ;;  %v2528_v53 = vld [vmem:[#allocation5 + $0x1a0] ss:$16 sps:$4 sm:$0xff]   ;;  %v100_v55 = vadd.f32 %v96_v50, %v91_v48  ;;  %v102_v56 = vadd.f32 %v98_v51, %v93_v49  ;;  %v2549_v25 = vld [vmem:[#allocation5 + $0x8c] ss:$16 sps:$4 sm:$0xff]  }
  0x5c   :  { %534 = vmatpush1.bf16.msra.mxu1 %v2501_v9  ;;  %v105_v54 = vld [vmem:[#allocation2 + $0x60] sm:$0xff]  ;;  %v107_v57 = vld [vmem:[#allocation2 + $0x70] sm:$0xff]  ;;  %1445 = vmatprep.subr.bf16.mxu0 %v2583_v52  ;;  %v2547_v28 = vld [vmem:[#allocation5 + $0x88] ss:$16 sps:$4 sm:$0xff]  }
  0x5d   :  { %535 = vmatprep.subr.bf16.mxu1 %v2502_v10  ;;  %v2588_v58 = vld [vmem:[#allocation7] ss:$16 sps:$4 sm:$0xff]   ;;  %v2589_v59 = vld [vmem:[#allocation7 + $0x24] ss:$16 sps:$4 sm:$0xff]   ;;  %v109_v62 = vadd.f32 %v105_v54, %v100_v55  ;;  %v111_v63 = vadd.f32 %v107_v57, %v102_v56  ;;  %v2552_v29 = vld [vmem:[#allocation5 + $0xac] ss:$16 sps:$4 sm:$0xff]  }
  0x5e   :  { %v2529_v60 = vld [vmem:[#allocation5 + $0x1c4] ss:$16 sps:$4 sm:$0xff]   ;;  %1446 = vmatpush1.bf16.msra.mxu0 %v2588_v58  ;;  %v2594_v61 = vld [vmem:[#allocation7 + $0x20] ss:$16 sps:$4 sm:$0xff]   ;;  %v2550_v32 = vld [vmem:[#allocation5 + $0xa8] ss:$16 sps:$4 sm:$0xff]  }
  0x5f   :  { %1447 = vmatprep.subr.bf16.mxu0 %v2589_v59  ;;  %v2595_v0 = vld [vmem:[#allocation7 + $0x44] ss:$16 sps:$4 sm:$0xff]   ;;  %v2531_v1 = vld [vmem:[#allocation5 + $0x1c0] ss:$16 sps:$4 sm:$0xff]   ;;  %v113_v5 = vmul.f32 0.25, %v109_v62  ;;  %v115_v6 = vmul.f32 0.25, %v111_v63 }
  0x60   :  { %536 = vmatpush1.bf16.msra.mxu1 %v2504_v11  ;;  %v2532_v2 = vld [vmem:[#allocation5 + $0x1e4] ss:$16 sps:$4 sm:$0xff]   ;;  %v2600_v3 = vld [vmem:[#allocation7 + $0x40] ss:$16 sps:$4 sm:$0xff]   ;;  %v2562_v41 = vld [vmem:[#allocation5 + $0x128] ss:$16 sps:$4 sm:$0xff]  }
  0x61   :  { %537 = vmatprep.subr.bf16.mxu1 %v2505_v12  ;;  %v2601_v4 = vld [vmem:[#allocation7 + $0x64] ss:$16 sps:$4 sm:$0xff]   ;;  %v2534_v7 = vld [vmem:[#allocation5 + $0x1e0] ss:$16 sps:$4 sm:$0xff]   ;;  %v3151_v11 = vpack.c.bf16 %v115_v6, %v113_v5  ;;  %v2535_v12 = vld [vmem:[#allocation5 + $0x8] ss:$16 sps:$4 sm:$0xff]  }
  0x62   :  { %1448 = vmatpush1.bf16.msra.mxu0 %v2594_v61  ;;  %v2606_v9 = vld [vmem:[#allocation7 + $0x60] ss:$16 sps:$4 sm:$0xff]   ;;  %v2607_v10 = vld [vmem:[#allocation7 + $0x84] ss:$16 sps:$4 sm:$0xff]   ;;  %v2567_v42 = vld [vmem:[#allocation5 + $0x14c] ss:$16 sps:$4 sm:$0xff]  }
  0x63   :  { %1449 = vmatprep.subr.bf16.mxu0 %v2595_v0  ;;  %v2612_v14 = vld [vmem:[#allocation7 + $0x80] ss:$16 sps:$4 sm:$0xff]   ;;  %v2613_v15 = vld [vmem:[#allocation7 + $0xa4] ss:$16 sps:$4 sm:$0xff]   ;;  %v2565_v43 = vld [vmem:[#allocation5 + $0x148] ss:$16 sps:$4 sm:$0xff]  }
  0x64   :  { %538 = vmatpush1.bf16.msra.mxu1 %v2507_v18  ;;  %v2618_v18 = vld [vmem:[#allocation7 + $0xa0] ss:$16 sps:$4 sm:$0xff]   ;;  %v2619_v19 = vld [vmem:[#allocation7 + $0xc4] ss:$16 sps:$4 sm:$0xff]   ;;  %v2570_v44 = vld [vmem:[#allocation5 + $0x16c] ss:$16 sps:$4 sm:$0xff]  }
  0x65   :  { %539 = vmatprep.subr.bf16.mxu1 %v2508_v22  ;;  %v2624_v22 = vld [vmem:[#allocation7 + $0xc0] ss:$16 sps:$4 sm:$0xff]   ;;  %v2625_v23 = vld [vmem:[#allocation7 + $0xe4] ss:$16 sps:$4 sm:$0xff]   ;;  %v2576_v48 = vld [vmem:[#allocation5 + $0x1ac] ss:$16 sps:$4 sm:$0xff]  }
  0x66   :  { %1450 = vmatpush1.bf16.msra.mxu0 %v2600_v3  ;;  %v2630_v26 = vld [vmem:[#allocation7 + $0xe0] ss:$16 sps:$4 sm:$0xff]   ;;  %v2637_v31 = vld [vmem:[#allocation7 + $0x124] ss:$16 sps:$4 sm:$0xff]   ;;  %v2574_v49 = vld [vmem:[#allocation5 + $0x1a8] ss:$16 sps:$4 sm:$0xff]  }
  0x67   :  { %1451 = vmatprep.subr.bf16.mxu0 %v2601_v4  ;;  %v2579_v50 = vld [vmem:[#allocation5 + $0x1cc] ss:$16 sps:$4 sm:$0xff]   ;;  %v2577_v51 = vld [vmem:[#allocation5 + $0x1c8] ss:$16 sps:$4 sm:$0xff]   ;;  %v2643_v3 = vld [vmem:[#allocation7 + $0x144] ss:$16 sps:$4 sm:$0xff]  }
  0x68   :  { %540 = vmatpush1.bf16.msra.mxu1 %v2510_v27  ;;  %v2631_v27 = vld [vmem:[#allocation7 + $0x104] ss:$16 sps:$4 sm:$0xff]   ;;  %v2582_v52 = vld [vmem:[#allocation5 + $0x1ec] ss:$16 sps:$4 sm:$0xff]   ;;  %v2585_v55 = vld [vmem:[#allocation7 + $0x8] ss:$16 sps:$4 sm:$0xff]  }
  0x69   :  { %541 = vmatprep.subr.bf16.mxu1 %v2511_v30  ;;  %v2636_v30 = vld [vmem:[#allocation7 + $0x100] ss:$16 sps:$4 sm:$0xff]   ;;  %v2587_v54 = vld [vmem:[#allocation7 + $0xc] ss:$16 sps:$4 sm:$0xff]   ;;  %v2591_v57 = vld [vmem:[#allocation7 + $0x28] ss:$16 sps:$4 sm:$0xff]  }
  0x6a   :  { %1452 = vmatpush1.bf16.msra.mxu0 %v2606_v9  ;;  %v2593_v56 = vld [vmem:[#allocation7 + $0x2c] ss:$16 sps:$4 sm:$0xff]   ;;  %v2597_v59 = vld [vmem:[#allocation7 + $0x48] ss:$16 sps:$4 sm:$0xff]   ;;  %v2648_v4 = vld [vmem:[#allocation7 + $0x140] ss:$16 sps:$4 sm:$0xff]  }
  0x6b   :  { %1453 = vmatprep.subr.bf16.mxu0 %v2607_v10  ;;  %v2599_v58 = vld [vmem:[#allocation7 + $0x4c] ss:$16 sps:$4 sm:$0xff]   ;;  %v2603_v61 = vld [vmem:[#allocation7 + $0x68] ss:$16 sps:$4 sm:$0xff]  }
  0x6c   :  { %542 = vmatpush1.bf16.msra.mxu1 %v2513_v33  ;;  %v2555_v33 = vld [vmem:[#allocation5 + $0xcc] ss:$16 sps:$4 sm:$0xff]   ;;  %v2609_v63 = vld [vmem:[#allocation7 + $0x88] ss:$16 sps:$4 sm:$0xff]  }
  0x6d   :  { %543 = vmatprep.subr.bf16.mxu1 %v2514_v35  ;;  %v2553_v35 = vld [vmem:[#allocation5 + $0xc8] ss:$16 sps:$4 sm:$0xff]   ;;  %v2611_v62 = vld [vmem:[#allocation7 + $0x8c] ss:$16 sps:$4 sm:$0xff]  }
  0x6e   :  { %1454 = vmatpush1.bf16.msra.mxu0 %v2612_v14  ;;  %v2617_v0 = vld [vmem:[#allocation7 + $0xac] ss:$16 sps:$4 sm:$0xff]   ;;  %v2621_v5 = vld [vmem:[#allocation7 + $0xc8] ss:$16 sps:$4 sm:$0xff]  }
  0x6f   :  { %1455 = vmatprep.subr.bf16.mxu0 %v2613_v15  ;;  %v2629_v6 = vld [vmem:[#allocation7 + $0xec] ss:$16 sps:$4 sm:$0xff]   ;;  %v2627_v9 = vld [vmem:[#allocation7 + $0xe8] ss:$16 sps:$4 sm:$0xff]   ;;  %v2661_v15 = vld [vmem:[#allocation7 + $0x1a4] ss:$16 sps:$4 sm:$0xff]  }
  0x70   :  { %544 = vmatpush1.bf16.msra.mxu1 %v2516_v36  ;;  %v2558_v36 = vld [vmem:[#allocation5 + $0xec] ss:$16 sps:$4 sm:$0xff]  }
  0x71   :  { %545 = vmatprep.subr.bf16.mxu1 %v2517_v37  ;;  %v2556_v37 = vld [vmem:[#allocation5 + $0xe8] ss:$16 sps:$4 sm:$0xff]   ;;  %v2635_v10 = vld [vmem:[#allocation7 + $0x10c] ss:$16 sps:$4 sm:$0xff]  }
  0x72   :  { %1456 = vmatpush1.bf16.msra.mxu0 %v2618_v18  ;;  %v2641_v14 = vld [vmem:[#allocation7 + $0x12c] ss:$16 sps:$4 sm:$0xff]  }
  0x73   :  { %1457 = vmatprep.subr.bf16.mxu0 %v2619_v19  ;;  %v2647_v18 = vld [vmem:[#allocation7 + $0x14c] ss:$16 sps:$4 sm:$0xff]   ;;  %v2667_v19 = vld [vmem:[#allocation7 + $0x1c4] ss:$16 sps:$4 sm:$0xff]  }
  0x74   :  { %546 = vmatpush1.bf16.msra.mxu1 %v2519_v38  ;;  %v2561_v38 = vld [vmem:[#allocation5 + $0x10c] ss:$16 sps:$4 sm:$0xff]  }
  0x75   :  { %547 = vmatprep.subr.bf16.mxu1 %v2520_v39  ;;  %v2559_v39 = vld [vmem:[#allocation5 + $0x108] ss:$16 sps:$4 sm:$0xff]  }
  0x76   :  { %1458 = vmatpush1.bf16.msra.mxu0 %v2624_v22  ;;  %v2653_v22 = vld [vmem:[#allocation7 + $0x16c] ss:$16 sps:$4 sm:$0xff]  }
  0x77   :  { %1459 = vmatprep.subr.bf16.mxu0 %v2625_v23  ;;  %v2673_v23 = vld [vmem:[#allocation7 + $0x1e4] ss:$16 sps:$4 sm:$0xff]  }
  0x78   :  { %548 = vmatpush1.bf16.msra.mxu1 %v2522_v40  ;;  %v2564_v40 = vld [vmem:[#allocation5 + $0x12c] ss:$16 sps:$4 sm:$0xff]  }
  0x79   :  { %549 = vmatprep.subr.bf16.mxu1 %v2523_v45  ;;  %v2568_v45 = vld [vmem:[#allocation5 + $0x168] ss:$16 sps:$4 sm:$0xff]  }
  0x7a   :  { %1460 = vmatpush1.bf16.msra.mxu0 %v2630_v26  ;;  %v2659_v26 = vld [vmem:[#allocation7 + $0x18c] ss:$16 sps:$4 sm:$0xff]  }
  0x7b   :  { %1461 = vmatprep.subr.bf16.mxu0 %v2631_v27  ;;  %v2681_v27 = vld [vmem:[#allocation7 + $0x204] ss:$16 sps:$4 sm:$0xff]  }
  0x7c   :  { %550 = vmatpush1.bf16.msra.mxu1 %v2525_v46  ;;  %v2573_v46 = vld [vmem:[#allocation5 + $0x18c] ss:$16 sps:$4 sm:$0xff]  }
  0x7d   :  { %551 = vmatprep.subr.bf16.mxu1 %v2526_v47  ;;  %v2571_v47 = vld [vmem:[#allocation5 + $0x188] ss:$16 sps:$4 sm:$0xff]  }
  0x7e   :  { %1462 = vmatpush1.bf16.msra.mxu0 %v2636_v30  ;;  %v2663_v30 = vld [vmem:[#allocation7 + $0x1a8] ss:$16 sps:$4 sm:$0xff]  }
  0x7f   :  { %1463 = vmatprep.subr.bf16.mxu0 %v2637_v31  ;;  %v2671_v31 = vld [vmem:[#allocation7 + $0x1cc] ss:$16 sps:$4 sm:$0xff]  }
  0x80   :  { %552 = vmatpush1.bf16.msra.mxu1 %v2528_v53  ;;  %v2580_v53 = vld [vmem:[#allocation5 + $0x1e8] ss:$16 sps:$4 sm:$0xff]  }
  0x81   :  { %553 = vmatprep.subr.bf16.mxu1 %v2529_v60  ;;  %v2605_v60 = vld [vmem:[#allocation7 + $0x6c] ss:$16 sps:$4 sm:$0xff]  }
  0x84   :  { %554 = vmatpush1.bf16.msra.mxu1 %v2531_v1  ;;  %v2615_v1 = vld [vmem:[#allocation7 + $0xa8] ss:$16 sps:$4 sm:$0xff]  }
  0x85   :  { %555 = vmatprep.subr.bf16.mxu1 %v2532_v2  ;;  %v2623_v2 = vld [vmem:[#allocation7 + $0xcc] ss:$16 sps:$4 sm:$0xff]  }
  0x88   :  { %556 = vmatpush1.bf16.msra.mxu1 %v2534_v7  ;;  %v2649_v7 = vld [vmem:[#allocation7 + $0x164] ss:$16 sps:$4 sm:$0xff]  }
  0x89   :  { %568 = vmatprep.subr.bf16.mxu1 %v2537_v8  ;;  %v2654_v8 = vld [vmem:[#allocation7 + $0x160] ss:$16 sps:$4 sm:$0xff]  }
  0x8b   :  { %558 = vmatmul.mubr.bf16.vlgmr.msra.gmra.mrb[0].mxu1 %v3151_v11 }
  0x8c   :  { %569 = vmatpush1.bf16.msra.mxu1 %v2535_v12  ;;  %600 = vmatprep.mubr.bf16.mxu1 %v3148_v34  ;;  %v2642_v34 = vld [vmem:[#allocation7 + $0x120] ss:$16 sps:$4 sm:$0xff]  }
  0x8d   :  { %570 = vmatprep.subr.bf16.mxu1 %v2540_v13  ;;  %1464 = vmatpush1.bf16.msra.mxu0 %v2642_v34  ;;  %v2660_v12 = vld [vmem:[#allocation7 + $0x180] ss:$16 sps:$4 sm:$0xff]   ;;  %v2633_v13 = vld [vmem:[#allocation7 + $0x108] ss:$16 sps:$4 sm:$0xff]  }
  0x8e   :  { %1465 = vmatprep.subr.bf16.mxu0 %v2643_v3  ;;  %v2675_v34 = vld [vmem:[#allocation7 + $0x1e8] ss:$16 sps:$4 sm:$0xff]  }
  0x90   :  { %571 = vmatpush1.bf16.msra.mxu1 %v2538_v16  ;;  %v2666_v16 = vld [vmem:[#allocation7 + $0x1a0] ss:$16 sps:$4 sm:$0xff]  }
  0x91   :  { %572 = vmatprep.subr.bf16.mxu1 %v2543_v17  ;;  %1466 = vmatpush1.bf16.msra.mxu0 %v2648_v4  ;;  %v2639_v17 = vld [vmem:[#allocation7 + $0x128] ss:$16 sps:$4 sm:$0xff]  }
  0x92   :  { %1467 = vmatprep.subr.bf16.mxu0 %v2649_v7 }
  0x94   :  { %573 = vmatpush1.bf16.msra.mxu1 %v2541_v20  ;;  %v2672_v20 = vld [vmem:[#allocation7 + $0x1c0] ss:$16 sps:$4 sm:$0xff]  }
  0x95   :  { %574 = vmatprep.subr.bf16.mxu1 %v2546_v21  ;;  %1468 = vmatpush1.bf16.msra.mxu0 %v2654_v8  ;;  %v2645_v21 = vld [vmem:[#allocation7 + $0x148] ss:$16 sps:$4 sm:$0xff]  }
  0x98   :  { %575 = vmatpush1.bf16.msra.mxu1 %v2544_v24  ;;  %v2678_v24 = vld [vmem:[#allocation7 + $0x1e0] ss:$16 sps:$4 sm:$0xff]  }
  0x99   :  { %576 = vmatprep.subr.bf16.mxu1 %v2549_v25  ;;  %v2651_v25 = vld [vmem:[#allocation7 + $0x168] ss:$16 sps:$4 sm:$0xff]  }
  0x9c   :  { %577 = vmatpush1.bf16.msra.mxu1 %v2547_v28  ;;  %v2657_v28 = vld [vmem:[#allocation7 + $0x188] ss:$16 sps:$4 sm:$0xff]  }
  0x9d   :  { %578 = vmatprep.subr.bf16.mxu1 %v2552_v29  ;;  %v2665_v29 = vld [vmem:[#allocation7 + $0x1ac] ss:$16 sps:$4 sm:$0xff]  }
  0xa0   :  { %579 = vmatpush1.bf16.msra.mxu1 %v2550_v32  ;;  %v2669_v32 = vld [vmem:[#allocation7 + $0x1c8] ss:$16 sps:$4 sm:$0xff]  }
  0xa1   :  { %580 = vmatprep.subr.bf16.mxu1 %v2555_v33  ;;  %v2677_v33 = vld [vmem:[#allocation7 + $0x1ec] ss:$16 sps:$4 sm:$0xff]  }
  0xa4   :  { %581 = vmatpush1.bf16.msra.mxu1 %v2553_v35  ;;  %v2684_v35 = vld [vmem:[#allocation7 + $0x20c] ss:$16 sps:$4 sm:$0xff]  }
  0xa5   :  { %582 = vmatprep.subr.bf16.mxu1 %v2558_v36  ;;  %v185_v36 = vlaneseq }
  0xa8   :  { %583 = vmatpush1.bf16.msra.mxu1 %v2556_v37  ;;  %v3156_v37 = vshrl.u32 %v185_v36, 7  ;;  %v2726_v36 = vld [vmem:[#allocation7 + $0x2ec] ss:$16 sps:$4 sm:$0xff]  }
  0xa9   :  { %584 = vmatprep.subr.bf16.mxu1 %v2561_v38 }
  0xaa   :  { %v3159_v38 = vsub.s32 0, %v3156_v37 }
  0xac   :  { %585 = vmatpush1.bf16.msra.mxu1 %v2559_v39  ;;  %v3164_v39 = vld [vmem:[%s3221_s2] sm:$0xf] }
  0xad   :  { %586 = vmatprep.subr.bf16.mxu1 %v2564_v40  ;;  %v3167_v40 = vsub.s32 1, %v3156_v37 }
  0xb0   :  { %587 = vmatpush1.bf16.msra.mxu1 %v2562_v41  ;;  %v188_v41 = vrot.slane %v3164_v39, %v3159_v38 }
  0xb1   :  { %588 = vmatprep.subr.bf16.mxu1 %v2567_v42  ;;  %v192_v42 = vrot.slane %v3164_v39, %v3167_v40 }
  0xb4   :  { %589 = vmatpush1.bf16.msra.mxu1 %v2565_v43 }
  0xb5   :  { %590 = vmatprep.subr.bf16.mxu1 %v2570_v44 }
  0xb8   :  { %591 = vmatpush1.bf16.msra.mxu1 %v2568_v45 }
  0xb9   :  { %592 = vmatprep.subr.bf16.mxu1 %v2573_v46 }
  0xbc   :  { %593 = vmatpush1.bf16.msra.mxu1 %v2571_v47 }
  0xbd   :  { %594 = vmatprep.subr.bf16.mxu1 %v2576_v48 }
  0xc0   :  { %595 = vmatpush1.bf16.msra.mxu1 %v2574_v49 }
  0xc1   :  { %596 = vmatprep.subr.bf16.mxu1 %v2579_v50 }
  0xc4   :  { %597 = vmatpush1.bf16.msra.mxu1 %v2577_v51 }
  0xc5   :  { %598 = vmatprep.subr.bf16.mxu1 %v2582_v52 }
  0xc8   :  { %599 = vmatpush1.bf16.msra.mxu1 %v2580_v53 }
  0xc9   :  { %1531 = vmatprep.subr.bf16.mxu1 %v2587_v54 }
  0xcb   :  { %601 = vmatmul.mubr.bf16.vlgmr.msra.gmra.mrb[4].mxu1 %v3151_v11  ;;  %v2655_v11 = vld [vmem:[#allocation7 + $0x184] ss:$16 sps:$4 sm:$0xff]  }
  0xcc   :  { %1532 = vmatpush1.bf16.msra.mxu1 %v2585_v55  ;;  %1469 = vmatprep.subr.bf16.mxu0 %v2655_v11  ;;  %v2687_v11 = vld [vmem:[#allocation7 + $0x224] ss:$16 sps:$4 sm:$0xff]  }
  0xcd   :  { %1533 = vmatprep.subr.bf16.mxu1 %v2593_v56  ;;  %1470 = vmatpush1.bf16.msra.mxu0 %v2660_v12  ;;  %v2690_v12 = vld [vmem:[#allocation7 + $0x22c] ss:$16 sps:$4 sm:$0xff]  }
  0xce   :  { %1471 = vmatprep.subr.bf16.mxu0 %v2661_v15  ;;  %v2693_v15 = vld [vmem:[#allocation7 + $0x244] ss:$16 sps:$4 sm:$0xff]  }
  0xd0   :  { %1534 = vmatpush1.bf16.msra.mxu1 %v2591_v57 }
  0xd1   :  { %1535 = vmatprep.subr.bf16.mxu1 %v2599_v58  ;;  %1472 = vmatpush1.bf16.msra.mxu0 %v2666_v16  ;;  %v2696_v16 = vld [vmem:[#allocation7 + $0x24c] ss:$16 sps:$4 sm:$0xff]  }
  0xd2   :  { %1473 = vmatprep.subr.bf16.mxu0 %v2667_v19  ;;  %v2699_v19 = vld [vmem:[#allocation7 + $0x264] ss:$16 sps:$4 sm:$0xff]  }
  0xd4   :  { %1536 = vmatpush1.bf16.msra.mxu1 %v2597_v59 }
  0xd5   :  { %1537 = vmatprep.subr.bf16.mxu1 %v2605_v60  ;;  %1474 = vmatpush1.bf16.msra.mxu0 %v2672_v20  ;;  %v2702_v20 = vld [vmem:[#allocation7 + $0x26c] ss:$16 sps:$4 sm:$0xff]  }
  0xd6   :  { %1475 = vmatprep.subr.bf16.mxu0 %v2673_v23  ;;  %v2705_v23 = vld [vmem:[#allocation7 + $0x284] ss:$16 sps:$4 sm:$0xff]  }
  0xd8   :  { %1538 = vmatpush1.bf16.msra.mxu1 %v2603_v61 }
  0xd9   :  { %1539 = vmatprep.subr.bf16.mxu1 %v2611_v62  ;;  %1476 = vmatpush1.bf16.msra.mxu0 %v2678_v24  ;;  %v2708_v24 = vld [vmem:[#allocation7 + $0x28c] ss:$16 sps:$4 sm:$0xff]  }
  0xda   :  { %1488 = vmatprep.subr.bf16.mxu0 %v2681_v27  ;;  %v2711_v27 = vld [vmem:[#allocation7 + $0x2a4] ss:$16 sps:$4 sm:$0xff]  }
  0xdc   :  { %1540 = vmatpush1.bf16.msra.mxu1 %v2609_v63 }
  0xdd   :  { %1541 = vmatprep.subr.bf16.mxu1 %v2617_v0 }
  0xe0   :  { %1542 = vmatpush1.bf16.msra.mxu1 %v2615_v1 }
  0xe1   :  { %1543 = vmatprep.subr.bf16.mxu1 %v2623_v2 }
  0xe4   :  { %1544 = vmatpush1.bf16.msra.mxu1 %v2621_v5 }
  0xe5   :  { %1545 = vmatprep.subr.bf16.mxu1 %v2629_v6 }
  0xe8   :  { %1546 = vmatpush1.bf16.msra.mxu1 %v2627_v9  ;;  %v2679_v9 = vld [vmem:[#allocation7 + $0x200] ss:$16 sps:$4 sm:$0xff]  }
  0xe9   :  { %1547 = vmatprep.subr.bf16.mxu1 %v2635_v10  ;;  %v2682_v10 = vld [vmem:[#allocation7 + $0x208] ss:$16 sps:$4 sm:$0xff]  }
  0xec   :  { %1548 = vmatpush1.bf16.msra.mxu1 %v2633_v13  ;;  %v2685_v13 = vld [vmem:[#allocation7 + $0x220] ss:$16 sps:$4 sm:$0xff]  }
  0xed   :  { %1549 = vmatprep.subr.bf16.mxu1 %v2641_v14  ;;  %v2688_v14 = vld [vmem:[#allocation7 + $0x228] ss:$16 sps:$4 sm:$0xff]  }
  0xf0   :  { %1550 = vmatpush1.bf16.msra.mxu1 %v2639_v17  ;;  %v2691_v17 = vld [vmem:[#allocation7 + $0x240] ss:$16 sps:$4 sm:$0xff]  }
  0xf1   :  { %1551 = vmatprep.subr.bf16.mxu1 %v2647_v18  ;;  %v2694_v18 = vld [vmem:[#allocation7 + $0x248] ss:$16 sps:$4 sm:$0xff]  }
  0xf4   :  { %1552 = vmatpush1.bf16.msra.mxu1 %v2645_v21  ;;  %v2697_v21 = vld [vmem:[#allocation7 + $0x260] ss:$16 sps:$4 sm:$0xff]  }
  0xf5   :  { %1553 = vmatprep.subr.bf16.mxu1 %v2653_v22  ;;  %v2700_v22 = vld [vmem:[#allocation7 + $0x268] ss:$16 sps:$4 sm:$0xff]  }
  0xf8   :  { %1554 = vmatpush1.bf16.msra.mxu1 %v2651_v25  ;;  %v2703_v25 = vld [vmem:[#allocation7 + $0x280] ss:$16 sps:$4 sm:$0xff]  }
  0xf9   :  { %1555 = vmatprep.subr.bf16.mxu1 %v2659_v26  ;;  %v2706_v26 = vld [vmem:[#allocation7 + $0x288] ss:$16 sps:$4 sm:$0xff]  }
  0xfc   :  { %1556 = vmatpush1.bf16.msra.mxu1 %v2657_v28  ;;  %v2714_v28 = vld [vmem:[#allocation7 + $0x2ac] ss:$16 sps:$4 sm:$0xff]  }
  0xfd   :  { %1557 = vmatprep.subr.bf16.mxu1 %v2665_v29  ;;  %v2709_v29 = vld [vmem:[#allocation7 + $0x2a0] ss:$16 sps:$4 sm:$0xff]  }
 0x100   :  { %1558 = vmatpush1.bf16.msra.mxu1 %v2663_v30  ;;  %v2712_v30 = vld [vmem:[#allocation7 + $0x2a8] ss:$16 sps:$4 sm:$0xff]  }
 0x101   :  { %1559 = vmatprep.subr.bf16.mxu1 %v2671_v31  ;;  %v2717_v31 = vld [vmem:[#allocation7 + $0x2c4] ss:$16 sps:$4 sm:$0xff]  }
 0x104   :  { %1560 = vmatpush1.bf16.msra.mxu1 %v2669_v32  ;;  %v2720_v32 = vld [vmem:[#allocation7 + $0x2cc] ss:$16 sps:$4 sm:$0xff]  }
 0x105   :  { %1561 = vmatprep.subr.bf16.mxu1 %v2677_v33  ;;  %v2715_v33 = vld [vmem:[#allocation7 + $0x2c0] ss:$16 sps:$4 sm:$0xff]  }
 0x108   :  { %1562 = vmatpush1.bf16.msra.mxu1 %v2675_v34  ;;  %v2718_v34 = vld [vmem:[#allocation7 + $0x2c8] ss:$16 sps:$4 sm:$0xff]  }
 0x109   :  { %1574 = vmatprep.subr.bf16.mxu1 %v2684_v35  ;;  %v2723_v35 = vld [vmem:[#allocation7 + $0x2e4] ss:$16 sps:$4 sm:$0xff]  }
 0x15e   :  { %v559_v43 = vpop.f32.mrb[0].mxu1 }
 0x15f   :  { %v560_v44 = vadd.f32 %v559_v43, %v188_v41  ;;  %v561_v45 = vpop.f32.mrb[1].mxu1  ;;  %v2729_v43 = vld [vmem:[#allocation7 + $0x304] ss:$16 sps:$4 sm:$0xff]  }
 0x160   :  { %v562_v46 = vadd.f32 %v561_v45, %v192_v42  ;;  %v563_v47 = vpop.f32.mrb[2].mxu1  ;;  %v2727_v45 = vld [vmem:[#allocation7 + $0x300] ss:$16 sps:$4 sm:$0xff]  }
 0x161   :  { %v619_v48 = vmul.f32 0.70710677, %v560_v44  ;;  %v564_v49 = vadd.f32 %v563_v47, %v188_v41  ;;  %v565_v50 = vpop.f32.mrb[3].mxu1  ;;  %v611_v61 = vmul.f32 0.5, %v560_v44  ;;  %v2721_v41 = vld [vmem:[#allocation7 + $0x2e0] ss:$16 sps:$4 sm:$0xff]  }
 0x162   :  { %v620_v51 = vmul.f32 0.70710677, %v562_v46  ;;  %v566_v52 = vadd.f32 %v565_v50, %v192_v42  ;;  %v612_v0 = vmul.f32 0.5, %v562_v46  ;;  %v2724_v42 = vld [vmem:[#allocation7 + $0x2e8] ss:$16 sps:$4 sm:$0xff]   ;;  %v199_v50 = vsub.s32 3, %v3156_v37 }
 0x163   :  { %2871 = verf.f32 %v619_v48  ;;  %v623_v53 = vmul.f32 0.70710677, %v564_v49  ;;  %v615_v62 = vmul.f32 0.5, %v564_v49  ;;  %v2732_v44 = vld [vmem:[#allocation7 + $0x30c] ss:$16 sps:$4 sm:$0xff]   ;;  %v195_v49 = vsub.s32 2, %v3156_v37 }
 0x164   :  { %2873 = verf.f32 %v620_v51  ;;  %v624_v54 = vmul.f32 0.70710677, %v566_v52  ;;  %v616_v1 = vmul.f32 0.5, %v566_v52  ;;  %v2730_v46 = vld [vmem:[#allocation7 + $0x308] ss:$16 sps:$4 sm:$0xff]  }
 0x165   :  { %2875 = verf.f32 %v623_v53  ;;  %v2735_v47 = vld [vmem:[#allocation7 + $0x324] ss:$16 sps:$4 sm:$0xff]   ;;  %v2738_v48 = vld [vmem:[#allocation7 + $0x32c] ss:$16 sps:$4 sm:$0xff]   ;;  %v2733_v51 = vld [vmem:[#allocation7 + $0x320] ss:$16 sps:$4 sm:$0xff]  }
 0x166   :  { %2877 = verf.f32 %v624_v54  ;;  %v2736_v52 = vld [vmem:[#allocation7 + $0x328] ss:$16 sps:$4 sm:$0xff]   ;;  %v2741_v53 = vld [vmem:[#allocation7 + $0x344] ss:$16 sps:$4 sm:$0xff]   ;;  %v2744_v54 = vld [vmem:[#allocation7 + $0x34c] ss:$16 sps:$4 sm:$0xff]  }
 0x16d   :  { %v2872_v55 = vpop.eup %2871 }
 0x16e   :  { %v2874_v56 = vpop.eup %2873  ;;  %v635_v57 = vadd.f32 1.0, %v2872_v55  ;;  %v196_v55 = vrot.slane %v3164_v39, %v195_v49 }
 0x16f   :  { %v2876_v58 = vpop.eup %2875  ;;  %v636_v59 = vadd.f32 1.0, %v2874_v56  ;;  %v200_v56 = vrot.slane %v3164_v39, %v199_v50  ;;  %v2748_v39 = vld [vmem:[#allocation7 + $0x368] ss:$16 sps:$4 sm:$0xff]  }
 0x170   :  { %v2878_v60 = vpop.eup %2877  ;;  %v639_v63 = vadd.f32 1.0, %v2876_v58  ;;  %v643_v3 = vmul.f32 %v635_v57, %v611_v61  ;;  %v2739_v57 = vld [vmem:[#allocation7 + $0x340] ss:$16 sps:$4 sm:$0xff]   ;;  %v2742_v58 = vld [vmem:[#allocation7 + $0x348] ss:$16 sps:$4 sm:$0xff]  }
 0x171   :  { %v640_v2 = vadd.f32 1.0, %v2878_v60  ;;  %v644_v5 = vmul.f32 %v636_v59, %v612_v0  ;;  %v2747_v60 = vld [vmem:[#allocation7 + $0x364] ss:$16 sps:$4 sm:$0xff]   ;;  %v2750_v61 = vld [vmem:[#allocation7 + $0x36c] ss:$16 sps:$4 sm:$0xff]  }
 0x172   :  { %v647_v4 = vmul.f32 %v639_v63, %v615_v62 }
 0x173   :  { %v648_v6 = vmul.f32 %v640_v2, %v616_v1  ;;  %v2745_v2 = vld [vmem:[#allocation7 + $0x360] ss:$16 sps:$4 sm:$0xff]  }
 0x174   :  { %v651_v7 = vpack.c.bf16 %v647_v4, %v643_v3 }
 0x175   :  { %v652_v8 = vpack.c.bf16 %v648_v6, %v644_v5 }
 0x177   :  { %1477 = vmatprep.mubr.bf16.mxu0 %v652_v8  ;;  %1563 = vmatprep.mubr.bf16.mxu1 %v652_v8  ;;  %v2753_v8 = vld [vmem:[#allocation7 + $0x384] ss:$16 sps:$4 sm:$0xff]  }
 0x178   :  { %1478 = vmatmul.mubr.bf16.vlgmr.msra.gmra.mrb[0].mxu0 %v651_v7  ;;  %1564 = vmatmul.mubr.bf16.vlgmr.msra.gmra.mrb[8].mxu1 %v651_v7 }
 0x179   :  { %1489 = vmatpush1.bf16.msra.mxu0 %v2679_v9  ;;  %1575 = vmatpush1.bf16.msra.mxu1 %v2682_v10  ;;  %v2756_v9 = vld [vmem:[#allocation7 + $0x38c] ss:$16 sps:$4 sm:$0xff]  }
 0x17a   :  { %1490 = vmatprep.subr.bf16.mxu0 %v2687_v11  ;;  %1576 = vmatprep.subr.bf16.mxu1 %v2690_v12  ;;  %v2751_v12 = vld [vmem:[#allocation7 + $0x380] ss:$16 sps:$4 sm:$0xff]  }
 0x17d   :  { %1491 = vmatpush1.bf16.msra.mxu0 %v2685_v13  ;;  %1577 = vmatpush1.bf16.msra.mxu1 %v2688_v14  ;;  %v2754_v13 = vld [vmem:[#allocation7 + $0x388] ss:$16 sps:$4 sm:$0xff]   ;;  %v2759_v14 = vld [vmem:[#allocation7 + $0x3a4] ss:$16 sps:$4 sm:$0xff]  }
 0x17e   :  { %1492 = vmatprep.subr.bf16.mxu0 %v2693_v15  ;;  %1578 = vmatprep.subr.bf16.mxu1 %v2696_v16  ;;  %v2762_v15 = vld [vmem:[#allocation7 + $0x3ac] ss:$16 sps:$4 sm:$0xff]   ;;  %v2757_v16 = vld [vmem:[#allocation7 + $0x3a0] ss:$16 sps:$4 sm:$0xff]  }
 0x181   :  { %1493 = vmatpush1.bf16.msra.mxu0 %v2691_v17  ;;  %1579 = vmatpush1.bf16.msra.mxu1 %v2694_v18  ;;  %v2760_v17 = vld [vmem:[#allocation7 + $0x3a8] ss:$16 sps:$4 sm:$0xff]   ;;  %v2765_v18 = vld [vmem:[#allocation7 + $0x3c4] ss:$16 sps:$4 sm:$0xff]  }
 0x182   :  { %1494 = vmatprep.subr.bf16.mxu0 %v2699_v19  ;;  %1580 = vmatprep.subr.bf16.mxu1 %v2702_v20  ;;  %v2768_v19 = vld [vmem:[#allocation7 + $0x3cc] ss:$16 sps:$4 sm:$0xff]  }
 0x185   :  { %1495 = vmatpush1.bf16.msra.mxu0 %v2697_v21  ;;  %1581 = vmatpush1.bf16.msra.mxu1 %v2700_v22  ;;  %v2763_v21 = vld [vmem:[#allocation7 + $0x3c0] ss:$16 sps:$4 sm:$0xff]   ;;  %v2766_v22 = vld [vmem:[#allocation7 + $0x3c8] ss:$16 sps:$4 sm:$0xff]  }
 0x186   :  { %1496 = vmatprep.subr.bf16.mxu0 %v2705_v23  ;;  %1582 = vmatprep.subr.bf16.mxu1 %v2708_v24 }
 0x189   :  { %1497 = vmatpush1.bf16.msra.mxu0 %v2703_v25  ;;  %1583 = vmatpush1.bf16.msra.mxu1 %v2706_v26  ;;  %v2771_v25 = vld [vmem:[#allocation7 + $0x3e4] ss:$16 sps:$4 sm:$0xff]   ;;  %v2774_v26 = vld [vmem:[#allocation7 + $0x3ec] ss:$16 sps:$4 sm:$0xff]  }
 0x18a   :  { %1498 = vmatprep.subr.bf16.mxu0 %v2711_v27  ;;  %1584 = vmatprep.subr.bf16.mxu1 %v2714_v28 }
 0x18d   :  { %1499 = vmatpush1.bf16.msra.mxu0 %v2709_v29  ;;  %1585 = vmatpush1.bf16.msra.mxu1 %v2712_v30 }
 0x18e   :  { %1500 = vmatprep.subr.bf16.mxu0 %v2717_v31  ;;  %1586 = vmatprep.subr.bf16.mxu1 %v2720_v32 }
 0x191   :  { %1501 = vmatpush1.bf16.msra.mxu0 %v2715_v33  ;;  %1587 = vmatpush1.bf16.msra.mxu1 %v2718_v34  ;;  %v2769_v33 = vld [vmem:[#allocation7 + $0x3e0] ss:$16 sps:$4 sm:$0xff]  }
 0x192   :  { %1502 = vmatprep.subr.bf16.mxu0 %v2723_v35  ;;  %1588 = vmatprep.subr.bf16.mxu1 %v2726_v36 }
 0x195   :  { %1503 = vmatpush1.bf16.msra.mxu0 %v2721_v41  ;;  %1589 = vmatpush1.bf16.msra.mxu1 %v2724_v42  ;;  %v2772_v41 = vld [vmem:[#allocation7 + $0x3e8] ss:$16 sps:$4 sm:$0xff]  }
 0x196   :  { %1504 = vmatprep.subr.bf16.mxu0 %v2729_v43  ;;  %1590 = vmatprep.subr.bf16.mxu1 %v2732_v44  ;;  %v2777_v44 = vld [vmem:[#allocation8 + $0x4] ss:$8 sps:$4 sm:$0xff]  }
 0x199   :  { %1505 = vmatpush1.bf16.msra.mxu0 %v2727_v45  ;;  %1591 = vmatpush1.bf16.msra.mxu1 %v2730_v46 }
 0x19a   :  { %1506 = vmatprep.subr.bf16.mxu0 %v2735_v47  ;;  %1592 = vmatprep.subr.bf16.mxu1 %v2738_v48 }
 0x19d   :  { %1507 = vmatpush1.bf16.msra.mxu0 %v2733_v51  ;;  %1593 = vmatpush1.bf16.msra.mxu1 %v2736_v52  ;;  %v2775_v51 = vld [vmem:[#allocation8] ss:$8 sps:$4 sm:$0xff]   ;;  %v2780_v52 = vld [vmem:[#allocation8 + $0x14] ss:$8 sps:$4 sm:$0xff]  }
 0x19e   :  { %v602_v59 = vpop.f32.mrb[4].mxu1  ;;  %1508 = vmatprep.subr.bf16.mxu0 %v2741_v53  ;;  %1594 = vmatprep.subr.bf16.mxu1 %v2744_v54  ;;  %v2778_v53 = vld [vmem:[#allocation8 + $0x10] ss:$8 sps:$4 sm:$0xff]   ;;  %v2783_v54 = vld [vmem:[#allocation8 + $0x24] ss:$8 sps:$4 sm:$0xff]  }
 0x19f   :  { %v603_v62 = vadd.f32 %v602_v59, %v196_v55  ;;  %v604_v63 = vpop.f32.mrb[5].mxu1  ;;  %v2787_v59 = vld [vmem:[#allocation8 + $0x40] ss:$8 sps:$4 sm:$0xff]  }
 0x1a0   :  { %v605_v0 = vadd.f32 %v604_v63, %v200_v56  ;;  %v606_v1 = vpop.f32.mrb[6].mxu1  ;;  %v2793_v63 = vld [vmem:[#allocation8 + $0x60] ss:$8 sps:$4 sm:$0xff]  }
 0x1a1   :  { %v621_v3 = vmul.f32 0.70710677, %v603_v62  ;;  %v607_v4 = vadd.f32 %v606_v1, %v196_v55  ;;  %v608_v5 = vpop.f32.mrb[7].mxu1  ;;  %1509 = vmatpush1.bf16.msra.mxu0 %v2739_v57  ;;  %1595 = vmatpush1.bf16.msra.mxu1 %v2742_v58  ;;  %v613_v30 = vmul.f32 0.5, %v603_v62  ;;  %v2781_v55 = vld [vmem:[#allocation8 + $0x20] ss:$8 sps:$4 sm:$0xff]  }
 0x1a2   :  { %v622_v6 = vmul.f32 0.70710677, %v605_v0  ;;  %v609_v7 = vadd.f32 %v608_v5, %v200_v56  ;;  %1510 = vmatprep.subr.bf16.mxu0 %v2747_v60  ;;  %1596 = vmatprep.subr.bf16.mxu1 %v2750_v61  ;;  %v614_v34 = vmul.f32 0.5, %v605_v0  ;;  %v2786_v56 = vld [vmem:[#allocation8 + $0x34] ss:$8 sps:$4 sm:$0xff]  }
 0x1a3   :  { %2879 = verf.f32 %v621_v3  ;;  %v625_v10 = vmul.f32 0.70710677, %v607_v4  ;;  %v617_v31 = vmul.f32 0.5, %v607_v4  ;;  %v2784_v57 = vld [vmem:[#allocation8 + $0x30] ss:$8 sps:$4 sm:$0xff]  }
 0x1a4   :  { %2881 = verf.f32 %v622_v6  ;;  %v626_v11 = vmul.f32 0.70710677, %v609_v7  ;;  %v618_v35 = vmul.f32 0.5, %v609_v7  ;;  %v2789_v58 = vld [vmem:[#allocation8 + $0x44] ss:$8 sps:$4 sm:$0xff]  }
 0x1a5   :  { %2883 = verf.f32 %v625_v10  ;;  %1511 = vmatpush1.bf16.msra.mxu0 %v2745_v2  ;;  %1597 = vmatpush1.bf16.msra.mxu1 %v2748_v39  ;;  %v2792_v60 = vld [vmem:[#allocation8 + $0x54] ss:$8 sps:$4 sm:$0xff]   ;;  %v2790_v61 = vld [vmem:[#allocation8 + $0x50] ss:$8 sps:$4 sm:$0xff]   ;;  %v2795_v62 = vld [vmem:[#allocation8 + $0x64] ss:$8 sps:$4 sm:$0xff]  }
 0x1a6   :  { %2885 = verf.f32 %v626_v11  ;;  %1512 = vmatprep.subr.bf16.mxu0 %v2753_v8  ;;  %1598 = vmatprep.subr.bf16.mxu1 %v2756_v9  ;;  %v2798_v0 = vld [vmem:[#allocation8 + $0x74] ss:$8 sps:$4 sm:$0xff]   ;;  %v2796_v1 = vld [vmem:[#allocation8 + $0x70] ss:$8 sps:$4 sm:$0xff]   ;;  %v2801_v2 = vld [vmem:[#allocation8 + $0x84] ss:$8 sps:$4 sm:$0xff]  }
 0x1a7   :  { %v2799_v3 = vld [vmem:[#allocation8 + $0x80] ss:$8 sps:$4 sm:$0xff]   ;;  %v2804_v4 = vld [vmem:[#allocation8 + $0x94] ss:$8 sps:$4 sm:$0xff]   ;;  %v2802_v5 = vld [vmem:[#allocation8 + $0x90] ss:$8 sps:$4 sm:$0xff]  }
 0x1a8   :  { %v2807_v39 = vld [vmem:[#allocation8 + $0xa4] ss:$8 sps:$4 sm:$0xff]   ;;  %v2805_v6 = vld [vmem:[#allocation8 + $0xa0] ss:$8 sps:$4 sm:$0xff]   ;;  %v2810_v7 = vld [vmem:[#allocation8 + $0xb4] ss:$8 sps:$4 sm:$0xff]  }
 0x1a9   :  { %1513 = vmatpush1.bf16.msra.mxu0 %v2751_v12  ;;  %1599 = vmatpush1.bf16.msra.mxu1 %v2754_v13  ;;  %v2808_v8 = vld [vmem:[#allocation8 + $0xb0] ss:$8 sps:$4 sm:$0xff]   ;;  %v2813_v9 = vld [vmem:[#allocation8 + $0xc4] ss:$8 sps:$4 sm:$0xff]   ;;  %v2811_v10 = vld [vmem:[#allocation8 + $0xc0] ss:$8 sps:$4 sm:$0xff]  }
 0x1aa   :  { %1514 = vmatprep.subr.bf16.mxu0 %v2759_v14  ;;  %1600 = vmatprep.subr.bf16.mxu1 %v2762_v15  ;;  %v2816_v11 = vld [vmem:[#allocation8 + $0xd4] ss:$8 sps:$4 sm:$0xff]   ;;  %v2814_v12 = vld [vmem:[#allocation8 + $0xd0] ss:$8 sps:$4 sm:$0xff]   ;;  %v2819_v13 = vld [vmem:[#allocation8 + $0xe4] ss:$8 sps:$4 sm:$0xff]  }
 0x1ab   :  { %v2817_v14 = vld [vmem:[#allocation8 + $0xe0] ss:$8 sps:$4 sm:$0xff]   ;;  %v2822_v15 = vld [vmem:[#allocation8 + $0xf4] ss:$8 sps:$4 sm:$0xff]  }
 0x1ad   :  { %v2880_v20 = vpop.eup %2879  ;;  %1515 = vmatpush1.bf16.msra.mxu0 %v2757_v16  ;;  %1601 = vmatpush1.bf16.msra.mxu1 %v2760_v17  ;;  %v2820_v16 = vld [vmem:[#allocation8 + $0xf0] ss:$8 sps:$4 sm:$0xff]   ;;  %v2825_v17 = vld [vmem:[#allocation8 + $0x104] ss:$8 sps:$4 sm:$0xff]  }
 0x1ae   :  { %v2882_v23 = vpop.eup %2881  ;;  %v637_v24 = vadd.f32 1.0, %v2880_v20  ;;  %1516 = vmatprep.subr.bf16.mxu0 %v2765_v18  ;;  %1602 = vmatprep.subr.bf16.mxu1 %v2768_v19  ;;  %v783_v18 = vld [vmem:[%s3223_s4] sm:$0xf] }
 0x1af   :  { %v2884_v27 = vpop.eup %2883  ;;  %v638_v28 = vadd.f32 1.0, %v2882_v23  ;;  %v788_v19 = vrot.slane %v783_v18, %v3159_v38  ;;  %v796_v20 = vrot.slane %v783_v18, %v195_v49 }
 0x1b0   :  { %v2886_v29 = vpop.eup %2885  ;;  %v641_v32 = vadd.f32 1.0, %v2884_v27  ;;  %v645_v42 = vmul.f32 %v637_v24, %v613_v30 }
 0x1b1   :  { %v642_v36 = vadd.f32 1.0, %v2886_v29  ;;  %1517 = vmatpush1.bf16.msra.mxu0 %v2763_v21  ;;  %1603 = vmatpush1.bf16.msra.mxu1 %v2766_v22  ;;  %v646_v45 = vmul.f32 %v638_v28, %v614_v34  ;;  %v792_v21 = vrot.slane %v783_v18, %v3167_v40  ;;  %v800_v22 = vrot.slane %v783_v18, %v199_v50 }
 0x1b2   :  { %v649_v43 = vmul.f32 %v641_v32, %v617_v31  ;;  %1518 = vmatprep.subr.bf16.mxu0 %v2771_v25  ;;  %1604 = vmatprep.subr.bf16.mxu1 %v2774_v26 }
 0x1b3   :  { %v650_v46 = vmul.f32 %v642_v36, %v618_v35 }
 0x1b4   :  { %v653_v47 = vpack.c.bf16 %v649_v43, %v645_v42 }
 0x1b5   :  { %1519 = vmatpush1.bf16.msra.mxu0 %v2769_v33  ;;  %1605 = vmatpush1.bf16.msra.mxu1 %v2772_v41  ;;  %v654_v48 = vpack.c.bf16 %v650_v46, %v646_v45 }
 0x1b6   :  { %2057 = vmatprep.subr.bf16.mxu0 %v2777_v44 }
 0x1b7   :  { %1520 = vmatprep.mubr.bf16.mxu0 %v654_v48  ;;  %1606 = vmatprep.mubr.bf16.mxu1 %v654_v48 }
 0x1b8   :  { %1521 = vmatmul.mubr.bf16.vlgmr.msra.gmra.mrb[0].mxu0 %v653_v47  ;;  %1607 = vmatmul.mubr.bf16.vlgmr.msra.gmra.mrb[8].mxu1 %v653_v47 }
 0x1b9   :  { %2058 = vmatpush1.bf16.msra.mxu0 %v2775_v51 }
 0x1ba   :  { %2059 = vmatprep.subr.bf16.mxu0 %v2780_v52 }
 0x1bd   :  { %2060 = vmatpush1.bf16.msra.mxu0 %v2778_v53 }
 0x1be   :  { %2061 = vmatprep.subr.bf16.mxu0 %v2783_v54 }
 0x1c1   :  { %2062 = vmatpush1.bf16.msra.mxu0 %v2781_v55 }
 0x1c2   :  { %2063 = vmatprep.subr.bf16.mxu0 %v2786_v56 }
 0x1c5   :  { %2064 = vmatpush1.bf16.msra.mxu0 %v2784_v57 }
 0x1c6   :  { %2065 = vmatprep.subr.bf16.mxu0 %v2789_v58 }
 0x1c9   :  { %2066 = vmatpush1.bf16.msra.mxu0 %v2787_v59 }
 0x1ca   :  { %2067 = vmatprep.subr.bf16.mxu0 %v2792_v60 }
 0x1cd   :  { %2068 = vmatpush1.bf16.msra.mxu0 %v2790_v61 }
 0x1ce   :  { %2069 = vmatprep.subr.bf16.mxu0 %v2795_v62 }
 0x1d1   :  { %2070 = vmatpush1.bf16.msra.mxu0 %v2793_v63 }
 0x1d2   :  { %2071 = vmatprep.subr.bf16.mxu0 %v2798_v0 }
 0x1d5   :  { %2072 = vmatpush1.bf16.msra.mxu0 %v2796_v1 }
 0x1d6   :  { %2073 = vmatprep.subr.bf16.mxu0 %v2801_v2 }
 0x1d9   :  { %2074 = vmatpush1.bf16.msra.mxu0 %v2799_v3 }
 0x1da   :  { %2075 = vmatprep.subr.bf16.mxu0 %v2804_v4 }
 0x1dd   :  { %2076 = vmatpush1.bf16.msra.mxu0 %v2802_v5 }
 0x1de   :  { %2077 = vmatprep.subr.bf16.mxu0 %v2807_v39 }
 0x1e1   :  { %2078 = vmatpush1.bf16.msra.mxu0 %v2805_v6 }
 0x1e2   :  { %2079 = vmatprep.subr.bf16.mxu0 %v2810_v7 }
 0x1e5   :  { %2080 = vmatpush1.bf16.msra.mxu0 %v2808_v8 }
 0x1e6   :  { %2081 = vmatprep.subr.bf16.mxu0 %v2813_v9 }
 0x1e9   :  { %2082 = vmatpush1.bf16.msra.mxu0 %v2811_v10 }
 0x1ea   :  { %2083 = vmatprep.subr.bf16.mxu0 %v2816_v11 }
 0x1ed   :  { %2084 = vmatpush1.bf16.msra.mxu0 %v2814_v12 }
 0x1ee   :  { %2085 = vmatprep.subr.bf16.mxu0 %v2819_v13 }
 0x1f1   :  { %2086 = vmatpush1.bf16.msra.mxu0 %v2817_v14 }
 0x1f2   :  { %2087 = vmatprep.subr.bf16.mxu0 %v2822_v15 }
 0x1f5   :  { %2088 = vmatpush1.bf16.msra.mxu0 %v2820_v16 }
 0x1f6   :  { %2100 = vmatprep.subr.bf16.mxu0 %v2825_v17 }
 0x28b   :  { %v1522_v23 = vpop.f32.mrb[0].mxu0  ;;  %v1608_v24 = vpop.f32.mrb[8].mxu1 }
 0x28c   :  { %v2454_v25 = vadd.f32 %v1522_v23, %v788_v19  ;;  %v2458_v26 = vadd.f32 %v1608_v24, %v796_v20  ;;  %v1524_v27 = vpop.f32.mrb[1].mxu0  ;;  %v1610_v28 = vpop.f32.mrb[9].mxu1  ;;  %v2826_v23 = vld [vmem:[#allocation8 + $0x110] ss:$8 sps:$4 sm:$0xff]   ;;  %v2831_v24 = vld [vmem:[#allocation8 + $0x124] ss:$8 sps:$4 sm:$0xff]  }
 0x28d   :  { %v2455_v29 = vadd.f32 %v1524_v27, %v792_v21  ;;  %v2459_v30 = vadd.f32 %v1610_v28, %v800_v22  ;;  %v1526_v31 = vpop.f32.mrb[2].mxu0  ;;  %v1612_v32 = vpop.f32.mrb[10].mxu1  ;;  %v2832_v27 = vld [vmem:[#allocation8 + $0x130] ss:$8 sps:$4 sm:$0xff]   ;;  %v2837_v28 = vld [vmem:[#allocation8 + $0x144] ss:$8 sps:$4 sm:$0xff]  }
 0x28e   :  { %v1625_v33 = vmul.f32 0.70710677, %v2454_v25  ;;  %v1627_v34 = vmul.f32 0.70710677, %v2458_v26  ;;  %v2456_v49 = vadd.f32 %v1526_v31, %v788_v19  ;;  %v2460_v41 = vadd.f32 %v1612_v32, %v796_v20  ;;  %v1528_v42 = vpop.f32.mrb[3].mxu0  ;;  %v1614_v37 = vpop.f32.mrb[11].mxu1 }
 0x28f   :  { %v1626_v35 = vmul.f32 0.70710677, %v2455_v29  ;;  %v1628_v36 = vmul.f32 0.70710677, %v2459_v30  ;;  %v2457_v50 = vadd.f32 %v1528_v42, %v792_v21  ;;  %v2461_v43 = vadd.f32 %v1614_v37, %v800_v22  ;;  %v2823_v20 = vld [vmem:[#allocation8 + $0x100] ss:$8 sps:$4 sm:$0xff]  }
 0x290   :  { %2887 = verf.f32 %v1625_v33  ;;  %v1629_v44 = vmul.f32 0.70710677, %v2456_v49  ;;  %v1631_v45 = vmul.f32 0.70710677, %v2460_v41  ;;  %v1617_v56 = vmul.f32 0.5, %v2454_v25 }
 0x291   :  { %2889 = verf.f32 %v1627_v34  ;;  %v1630_v46 = vmul.f32 0.70710677, %v2457_v50  ;;  %v1632_v47 = vmul.f32 0.70710677, %v2461_v43  ;;  %v1619_v57 = vmul.f32 0.5, %v2458_v26 }
 0x292   :  { %2891 = verf.f32 %v1626_v35  ;;  %v1618_v60 = vmul.f32 0.5, %v2455_v29  ;;  %v1621_v62 = vmul.f32 0.5, %v2456_v49  ;;  %v1620_v1 = vmul.f32 0.5, %v2459_v30  ;;  %v2828_v22 = vld [vmem:[#allocation8 + $0x114] ss:$8 sps:$4 sm:$0xff]  }
 0x293   :  { %2893 = verf.f32 %v1628_v36  ;;  %v1623_v3 = vmul.f32 0.5, %v2460_v41  ;;  %v1622_v7 = vmul.f32 0.5, %v2457_v50  ;;  %v1624_v11 = vmul.f32 0.5, %v2461_v43  ;;  %v2829_v25 = vld [vmem:[#allocation8 + $0x120] ss:$8 sps:$4 sm:$0xff]  }
 0x294   :  { %2895 = verf.f32 %v1629_v44  ;;  %v2834_v26 = vld [vmem:[#allocation8 + $0x134] ss:$8 sps:$4 sm:$0xff]   ;;  %v2835_v29 = vld [vmem:[#allocation8 + $0x140] ss:$8 sps:$4 sm:$0xff]   ;;  %v2838_v31 = vld [vmem:[#allocation8 + $0x150] ss:$8 sps:$4 sm:$0xff]  }
 0x295   :  { %2897 = verf.f32 %v1631_v45  ;;  %v2840_v30 = vld [vmem:[#allocation8 + $0x154] ss:$8 sps:$4 sm:$0xff]   ;;  %v2843_v32 = vld [vmem:[#allocation8 + $0x164] ss:$8 sps:$4 sm:$0xff]   ;;  %v2841_v33 = vld [vmem:[#allocation8 + $0x160] ss:$8 sps:$4 sm:$0xff]  }
 0x296   :  { %2899 = verf.f32 %v1630_v46  ;;  %v2846_v34 = vld [vmem:[#allocation8 + $0x174] ss:$8 sps:$4 sm:$0xff]   ;;  %v2844_v35 = vld [vmem:[#allocation8 + $0x170] ss:$8 sps:$4 sm:$0xff]   ;;  %v2849_v36 = vld [vmem:[#allocation8 + $0x184] ss:$8 sps:$4 sm:$0xff]  }
 0x297   :  { %2901 = verf.f32 %v1632_v47  ;;  %v2847_v49 = vld [vmem:[#allocation8 + $0x180] ss:$8 sps:$4 sm:$0xff]   ;;  %v2852_v41 = vld [vmem:[#allocation8 + $0x194] ss:$8 sps:$4 sm:$0xff]   ;;  %v2850_v42 = vld [vmem:[#allocation8 + $0x190] ss:$8 sps:$4 sm:$0xff]  }
 0x298   :  { %v2855_v37 = vld [vmem:[#allocation8 + $0x1a4] ss:$8 sps:$4 sm:$0xff]   ;;  %v2853_v50 = vld [vmem:[#allocation8 + $0x1a0] ss:$8 sps:$4 sm:$0xff]   ;;  %v2858_v43 = vld [vmem:[#allocation8 + $0x1b4] ss:$8 sps:$4 sm:$0xff]  }
 0x299   :  { %v2856_v44 = vld [vmem:[#allocation8 + $0x1b0] ss:$8 sps:$4 sm:$0xff]   ;;  %v2861_v45 = vld [vmem:[#allocation8 + $0x1c4] ss:$8 sps:$4 sm:$0xff]   ;;  %v2859_v46 = vld [vmem:[#allocation8 + $0x1c0] ss:$8 sps:$4 sm:$0xff]  }
 0x29a   :  { %v2888_v48 = vpop.eup %2887  ;;  %v2864_v47 = vld [vmem:[#allocation8 + $0x1d4] ss:$8 sps:$4 sm:$0xff]  }
 0x29b   :  { %v2890_v51 = vpop.eup %2889  ;;  %v1641_v54 = vadd.f32 1.0, %v2888_v48  ;;  %v2862_v48 = vld [vmem:[#allocation8 + $0x1d0] ss:$8 sps:$4 sm:$0xff]  }
 0x29c   :  { %v2892_v52 = vpop.eup %2891  ;;  %v1643_v58 = vadd.f32 1.0, %v2890_v51  ;;  %v2867_v51 = vld [vmem:[#allocation8 + $0x1e4] ss:$8 sps:$4 sm:$0xff]  }
 0x29d   :  { %v2894_v53 = vpop.eup %2893  ;;  %v1642_v61 = vadd.f32 1.0, %v2892_v52  ;;  %v1649_v39 = vmul.f32 %v1641_v54, %v1617_v56  ;;  %v2865_v52 = vld [vmem:[#allocation8 + $0x1e0] ss:$8 sps:$4 sm:$0xff]   ;;  %v2868_v54 = vld [vmem:[#allocation8 + $0x1f0] ss:$8 sps:$4 sm:$0xff]  }
 0x29e   :  { %v2896_v55 = vpop.eup %2895  ;;  %v1644_v2 = vadd.f32 1.0, %v2894_v53  ;;  %v3190_v9 = vmul.f32 %v1643_v58, %v1619_v57  ;;  %v2870_v53 = vld [vmem:[#allocation8 + $0x1f4] ss:$8 sps:$4 sm:$0xff]  }
 0x29f   :  { %v2898_v59 = vpop.eup %2897  ;;  %v1645_v63 = vadd.f32 1.0, %v2896_v55  ;;  %v1650_v13 = vmul.f32 %v1642_v61, %v1618_v60  ;;  %v1725_v55 = vld [vmem:[%s3225_s6] sm:$0x3]  ;;  %s3033_s6 = smov [#allocation10]  }
 0x2a0   :  { %v2900_v0 = vpop.eup %2899  ;;  %v1647_v4 = vadd.f32 1.0, %v2898_v59  ;;  %v1652_v16 = vmul.f32 %v1644_v2, %v1620_v1  ;;  %v1730_v56 = vrot.slane %v1725_v55, %v3159_v38  ;;  %v1734_v57 = vrot.slane %v1725_v55, %v3167_v40  ;;  %s2180_s30 = sshll.u32 %s3033_s6, 4  ;;  %s2181_s30 = int_to_ptr.vmem [resolvable:$true] %s2180_s30 }
 0x2a1   :  { %v2902_v5 = vpop.eup %2901  ;;  %v1653_v6 = vmul.f32 %v1645_v63, %v1621_v62  ;;  %v1646_v8 = vadd.f32 1.0, %v2900_v0  ;;  %s2995_s8 = scalar_lea.vmem %s2181_s30, 256  ;;  %p3000_p5 = scmp.lt.s32.totalorder %s2181_s30, %s2181_s30 }
 0x2a2   :  { %v3192_v10 = vmul.f32 %v1647_v4, %v1623_v3  ;;  %v1648_v12 = vadd.f32 1.0, %v2902_v5  ;;  %p2996_p4 = scmp.ne.s32.totalorder %s2181_s30, %s2995_s8  ;;  %p3001_p6 = scmp.lt.s32.totalorder %s2995_s8, %s2995_s8 }
 0x2a3   :  { %v1657_v14 = vpack.c.bf16 %v1653_v6, %v1649_v39  ;;  %v1654_v15 = vmul.f32 %v1646_v8, %v1622_v7 }
 0x2a4   :  { %v1659_v17 = vpack.c.bf16 %v3192_v10, %v3190_v9  ;;  %v1656_v18 = vmul.f32 %v1648_v12, %v1624_v11  ;;  %p3002_p7 = por %p3001_p6, %p3000_p5 }
 0x2a5   :  { %v1658_v19 = vpack.c.bf16 %v1654_v15, %v1650_v13 }
 0x2a6   :  { %v1660_v21 = vpack.c.bf16 %v1656_v18, %v1652_v16  ;;  %p3003_p8 = pnand %p3002_p7, %p2996_p4 }
 0x2a7   :  { %2089 = vmatprep.mubr.bf16.mxu0 %v1658_v19 }
 0x2a8   :  { %2090 = vmatmul.mubr.bf16.vlgmr.msra.gmra.mrb[4].mxu0 %v1657_v14 }
 0x2a9   :  { %2101 = vmatpush1.bf16.msra.mxu0 %v2823_v20  ;;  %2132 = vmatprep.mubr.bf16.mxu0 %v1660_v21 }
 0x2aa   :  { %2102 = vmatprep.subr.bf16.mxu0 %v2828_v22 }
 0x2ad   :  { %2103 = vmatpush1.bf16.msra.mxu0 %v2826_v23 }
 0x2ae   :  { %2104 = vmatprep.subr.bf16.mxu0 %v2831_v24 }
 0x2b1   :  { %2105 = vmatpush1.bf16.msra.mxu0 %v2829_v25 }
 0x2b2   :  { %2106 = vmatprep.subr.bf16.mxu0 %v2834_v26 }
 0x2b5   :  { %2107 = vmatpush1.bf16.msra.mxu0 %v2832_v27 }
 0x2b6   :  { %2108 = vmatprep.subr.bf16.mxu0 %v2837_v28 }
 0x2b9   :  { %2109 = vmatpush1.bf16.msra.mxu0 %v2835_v29 }
 0x2ba   :  { %2110 = vmatprep.subr.bf16.mxu0 %v2840_v30 }
 0x2bd   :  { %2111 = vmatpush1.bf16.msra.mxu0 %v2838_v31 }
 0x2be   :  { %2112 = vmatprep.subr.bf16.mxu0 %v2843_v32 }
 0x2c1   :  { %2113 = vmatpush1.bf16.msra.mxu0 %v2841_v33 }
 0x2c2   :  { %2114 = vmatprep.subr.bf16.mxu0 %v2846_v34 }
 0x2c5   :  { %2115 = vmatpush1.bf16.msra.mxu0 %v2844_v35 }
 0x2c6   :  { %2116 = vmatprep.subr.bf16.mxu0 %v2849_v36 }
 0x2c9   :  { %2117 = vmatpush1.bf16.msra.mxu0 %v2847_v49 }
 0x2ca   :  { %2118 = vmatprep.subr.bf16.mxu0 %v2852_v41 }
 0x2cd   :  { %2119 = vmatpush1.bf16.msra.mxu0 %v2850_v42 }
 0x2ce   :  { %2120 = vmatprep.subr.bf16.mxu0 %v2855_v37 }
 0x2d1   :  { %2121 = vmatpush1.bf16.msra.mxu0 %v2853_v50 }
 0x2d2   :  { %2122 = vmatprep.subr.bf16.mxu0 %v2858_v43 }
 0x2d5   :  { %2123 = vmatpush1.bf16.msra.mxu0 %v2856_v44 }
 0x2d6   :  { %2124 = vmatprep.subr.bf16.mxu0 %v2861_v45 }
 0x2d9   :  { %2125 = vmatpush1.bf16.msra.mxu0 %v2859_v46 }
 0x2da   :  { %2126 = vmatprep.subr.bf16.mxu0 %v2864_v47 }
 0x2dd   :  { %2127 = vmatpush1.bf16.msra.mxu0 %v2862_v48 }
 0x2de   :  { %2128 = vmatprep.subr.bf16.mxu0 %v2867_v51 }
 0x2e1   :  { %2129 = vmatpush1.bf16.msra.mxu0 %v2865_v52 }
 0x2e2   :  { %2130 = vmatprep.subr.bf16.mxu0 %v2870_v53 }
 0x2e5   :  { %2131 = vmatpush1.bf16.msra.mxu0 %v2868_v54 }
 0x2e8   :  { %2133 = vmatmul.mubr.bf16.vlgmr.msra.gmra.mrb[4].mxu0 %v1659_v17 }
 0x3bb   :  { %v2134_v58 = vpop.f32.mrb[4].mxu0 }
 0x3bc   :  { %v2462_v59 = vadd.f32 %v2134_v58, %v1730_v56  ;;  %v2136_v60 = vpop.f32.mrb[5].mxu0 }
 0x3bd   :  { %v2463_v61 = vadd.f32 %v2136_v60, %v1734_v57  ;;  %v2138_v62 = vpop.f32.mrb[6].mxu0 }
 0x3be   :  { %v2464_v63 = vadd.f32 %v2138_v62, %v1730_v56  ;;  %v2140_v0 = vpop.f32.mrb[7].mxu0  ;;  %v2143_v1 = vmul.f32 %v2462_v59, %v2462_v59 }
 0x3bf   :  { %v2465_v2 = vadd.f32 %v2140_v0, %v1734_v57  ;;  %v2144_v3 = vmul.f32 %v2463_v61, %v2463_v61 }
 0x3c0   :  { %v2145_v4 = vmul.f32 %v2464_v63, %v2464_v63 }
 0x3c1   :  { %v2146_v5 = vmul.f32 %v2465_v2, %v2465_v2  ;;  %v2147_v39 = vadd.f32 %v2144_v3, %v2143_v1 }
 0x3c3   :  { %2148 = vadd.xlane.f32.xlu0 %v2147_v39  ;;  %v2150_v6 = vadd.f32 %v2146_v5, %v2145_v4 }
 0x3c7   :  { %2151 = vadd.xlane.f32.xlu0 %v2150_v6 }
 0x450   :  { %v2149_v7 = vpop.xlane.xlu0 %2148 }
 0x451   :  { %v2153_v38 = vmax.f32 %v2149_v7, 1e-24 }
 0x453   :  { %2903 = vrsqrt.f32 %v2153_v38 }
 0x454   :  { %v2152_v40 = vpop.xlane.xlu0 %2151 }
 0x455   :  { %v2154_v8 = vmax.f32 %v2152_v40, 1e-24 }
 0x457   :  { %2905 = vrsqrt.f32 %v2154_v8 }
 0x45d   :  { %v2904_v9 = vpop.eup %2903 }
 0x45e   :  { %v2157_v10 = vmul.f32 %v2904_v9, %v2462_v59  ;;  %v2158_v11 = vmul.f32 %v2904_v9, %v2463_v61 }
 0x460   :  { %v2452_v12 = vpack.c.bf16 %v2158_v11, %v2157_v10 }
 0x461   :  { %v2906_v13 = vpop.eup %2905 }
 0x462   :  { %v2159_v14 = vmul.f32 %v2906_v13, %v2464_v63  ;;  %v2160_v15 = vmul.f32 %v2906_v13, %v2465_v2  ;;  %2173 = vst [vmem:[#allocation10] sm:$0xff] %v2452_v12 }
 0x464   :  { %v2453_v16 = vpack.c.bf16 %v2160_v15, %v2159_v14 }
 0x466   :  { %2174 = vst [vmem:[#allocation10 + $0x8] sm:$0xff] %v2453_v16 }
 0x467   :  { %3006 = shalt.err (!%p3003_p8)
}
 0x468   :  { %s3007_s11 = scalar_lea.hbm %s3226_s7, 256 }
 0x469   :  { %p3008_p9 = scmp.ne.s32.totalorder %s3226_s7, %s3007_s11  ;;  %p3011_p10 = scmp.lt.u32.totalorder %s3007_s11, %s3226_s7 }
 0x46b   :  { %p3013_p11 = pnand %p3011_p10, %p3008_p9 }
 0x46d   :  { %3016 = shalt.err (!%p3013_p11)
}
 0x46e   :  { %2186 = dma.vmem_to_hbm [thread:$0]  %s2181_s30, 256, %s3226_s7, [#allocation4], %s3031_s3, %s3031_s3, %s3032_s13  }
 0x46f   :  { %3023 = dma.done.wait [#allocation4], 256  }
 0x470   :  { %3024 = vsyncadd [#allocation4], 4294967040 }
 0x471   :  { %2190 = vsyncpa [#allocation3], 1 }
 0x472   :  { %2191 = vsyncpa [#allocation6], 1 }
 0x473   :  { %2192 = vsyncpa [#allocation9], 1 }
 0x474   :  { %2193 = vsyncpa [#allocation4], 1 }

</bundles_post_ra>
